<compile_context>
chip_gen: v7x
topology: tpu7x:2x2x1
jax: 0.10.0
libtpu: 0.0.40
codegen_flags: <defaults>
</compile_context>

<pallas_src>
import jax
import jax.numpy as jnp
from jax.experimental import pallas as pl
from jax.experimental.pallas import tpu as pltpu


# ----------------------------------------------------------------------------
# Kernel: one batch tile of the MLP + log_softmax, entirely in VMEM.
# All operands are already padded to lane-friendly widths (multiples of 128).
# ----------------------------------------------------------------------------
def probe_kernel(x_ref, w1_ref, b1_ref, w2_ref, b2_ref, wo_ref, bo_ref, o_ref):
    h = x_ref[...]  # (bn, D_pad) f32

    # hidden layer 1: Linear + ReLU   (Dropout is identity at inference)
    h = jnp.dot(h, w1_ref[...], preferred_element_type=jnp.float32) + b1_ref[...]
    h = jnp.maximum(h, 0.0)

    # hidden layer 2: Linear + ReLU
    h = jnp.dot(h, w2_ref[...], preferred_element_type=jnp.float32) + b2_ref[...]
    h = jnp.maximum(h, 0.0)

    # output projection to (padded) action logits; pad columns carry a -1e30
    # bias so they behave like -inf in the softmax without NaN risk.
    logits = jnp.dot(h, wo_ref[...], preferred_element_type=jnp.float32) + bo_ref[...]

    # numerically-stable log_softmax along the lane axis (128 wide)
    m = jnp.max(logits, axis=-1, keepdims=True)
    z = logits - m
    lse = jnp.log(jnp.sum(jnp.exp(z), axis=-1, keepdims=True))
    o_ref[...] = (z - lse).astype(o_ref.dtype)


# ----------------------------------------------------------------------------
# Wrapper helpers
# ----------------------------------------------------------------------------
def _round_up(n, m):
    return ((n + m - 1) // m) * m


def _tensorcores_per_device():
    """Best-effort guess of TensorCores behind one JAX device (megacore)."""
    try:
        kind = jax.devices()[0].device_kind.lower()
    except Exception:
        return 1
    for tag in ("v4", "v5p", "v7", "7x"):
        if tag in kind:
            return 2   # dual-TC / megacore chips
    return 1           # v2/v3 (per-core devices), v5e, v6e


def _default_bn(n_rows, cores, max_rows=512):
    """Largest row tile (<= max_rows) whose step count divides n_rows and is a
    multiple of the TensorCore count, so dual-TC chips get both cores busy
    while single-TC chips take a single big step for small N."""
    for steps in range(1, n_rows // 8 + 1):
        if n_rows % steps:
            continue
        bn = n_rows // steps
        if bn % 8 and bn != n_rows:
            continue   # (8,128) sublane rule unless full extent
        if steps % cores == 0 and bn <= max_rows:
            return bn
    return n_rows


def _pallas_forward(xp, w1p, b1p, w2p, b2p, wop, bop, bn, single_buffer_weights):
    n_rows, d_pad = xp.shape
    a_pad = wop.shape[1]
    grid = (n_rows // bn,)

    if single_buffer_weights:
        # Constant index_map -> double buffering buys nothing; keep one copy.
        def resident(arr):
            return pl.BlockSpec(arr.shape, lambda i, _nd=arr.ndim: (0,) * _nd,
                                pipeline_mode=pl.Buffered(1))
    else:
        def resident(arr):
            return pl.BlockSpec(arr.shape, lambda i, _nd=arr.ndim: (0,) * _nd)

    # Rough double-buffered VMEM footprint; only raise the scoped limit when a
    # very large bn would blow past the ~32 MiB default (matters on v7x where
    # physical VMEM is 64 MiB).
    footprint = 2 * bn * (d_pad + a_pad) * 4 + (2 * d_pad * d_pad + d_pad * a_pad) * 4
    vmem_limit = int(footprint * 1.25) if footprint > 24 * 1024 * 1024 else None

    return pl.pallas_call(
        probe_kernel,
        out_shape=jax.ShapeDtypeStruct((n_rows, a_pad), jnp.float32),
        grid_spec=pltpu.PrefetchScalarGridSpec(
            num_scalar_prefetch=0,
            grid=grid,
            in_specs=[
                pl.BlockSpec((bn, d_pad), lambda i: (i, 0)),   # x tile
                resident(w1p), resident(b1p),
                resident(w2p), resident(b2p),
                resident(wop), resident(bop),
            ],
            out_specs=pl.BlockSpec((bn, a_pad), lambda i: (i, 0)),
        ),
        compiler_params=pltpu.CompilerParams(
            dimension_semantics=("parallel",),
            vmem_limit_bytes=vmem_limit),
    )(xp, w1p, b1p, w2p, b2p, wop, bop)


def stack_action_probe_forward(x, w1, b1, w2, b2, wo, bo, *, bn=None):
    """x: (N, D) emb_pairs; weights in (in, out) layout; biases (1, out).

    Returns (N, A) log-probabilities, identical to the PyTorch forward at
    inference (Dropout = identity).
    """
    N, D = x.shape
    A = wo.shape[1]
    f32 = jnp.float32

    d_pad = _round_up(D, 128)
    a_pad = _round_up(A, 128)
    n_pad = _round_up(N, 8)

    # --- layout plumbing (done once, outside the kernel) ---------------------
    xp  = jnp.zeros((n_pad, d_pad), f32).at[:N, :D].set(x.astype(f32))
    w1p = jnp.zeros((d_pad, d_pad), f32).at[:D, :D].set(w1.astype(f32))
    b1p = jnp.zeros((1, d_pad), f32).at[:, :D].set(b1.astype(f32))
    w2p = jnp.zeros((d_pad, d_pad), f32).at[:D, :D].set(w2.astype(f32))
    b2p = jnp.zeros((1, d_pad), f32).at[:, :D].set(b2.astype(f32))
    wop = jnp.zeros((d_pad, a_pad), f32).at[:D, :A].set(wo.astype(f32))
    # large finite negative (not -inf) on pad action columns -> exp(.) == 0
    bop = jnp.full((1, a_pad), -1e30, f32).at[:, :A].set(bo.astype(f32))

    cores = _tensorcores_per_device()
    if bn is None:
        bn = _default_bn(n_pad, cores)
    assert n_pad % bn == 0 and (bn % 8 == 0 or bn == n_pad), (n_pad, bn)

    try:
        out = jax.block_until_ready(
            _pallas_forward(xp, w1p, b1p, w2p, b2p, wop, bop, bn, True))
    except Exception:
        # pipeline_mode single-buffering unsupported on this JAX build; the
        # default double-buffered weight blocks are functionally identical.
        out = _pallas_forward(xp, w1p, b1p, w2p, b2p, wop, bop, bn, False)

    return out[:N, :A]


def reference_forward(x, w1, b1, w2, b2, wo, bo):
    h = jnp.maximum(x @ w1 + b1, 0.0)
    h = jnp.maximum(h @ w2 + b2, 0.0)
    logits = h @ wo + bo
    return jax.nn.log_softmax(logits, axis=-1)


if __name__ == "__main__":
    # Synthetic config consistent with the module:
    #   model_dim = 32  ->  input_size D = 2 * 32 = 64
    #   num_layers = 3  ->  2 hidden (Linear+ReLU) layers + output Linear
    #   num_actions A = 8 (len(oracle.actions_list()))
    #   N = 128 emb_pairs (concatenated stack-top embedding pairs)
    # TODO(synk): training-mode Dropout RNG is not implemented (inference path only).
    model_dim = 32
    D = 2 * model_dim
    A = 8
    N = 128

    key = jax.random.PRNGKey(0)
    ks = jax.random.split(key, 7)

    scale = 1.0 / jnp.sqrt(D)
    x  = jax.random.normal(ks[0], (N, D), dtype=jnp.float32)
    w1 = jax.random.uniform(ks[1], (D, D), jnp.float32, -scale, scale)
    b1 = jax.random.uniform(ks[2], (1, D), jnp.float32, -scale, scale)
    w2 = jax.random.uniform(ks[3], (D, D), jnp.float32, -scale, scale)
    b2 = jax.random.uniform(ks[4], (1, D), jnp.float32, -scale, scale)
    wo = jax.random.uniform(ks[5], (D, A), jnp.float32, -scale, scale)
    bo = jax.random.uniform(ks[6], (1, A), jnp.float32, -scale, scale)

    out = stack_action_probe_forward(x, w1, b1, w2, b2, wo, bo)
    out = jax.block_until_ready(out)

    ref = reference_forward(x, w1, b1, w2, b2, wo, bo)
    assert out.shape == (N, A), out.shape
    assert jnp.allclose(out, ref, atol=1e-5, rtol=1e-5), "mismatch vs reference"

    print("KERNEL_OK")
</pallas_src>

<mosaic_0001>
module attributes {stable_mosaic.version = 11 : i64} {
  func.func @probe_kernel(%arg0: i32, %arg1: memref<128x128xf32, #tpu.memory_space<vmem>>, %arg2: memref<128x128xf32, #tpu.memory_space<vmem>>, %arg3: memref<1x128xf32, #tpu.memory_space<vmem>>, %arg4: memref<128x128xf32, #tpu.memory_space<vmem>>, %arg5: memref<1x128xf32, #tpu.memory_space<vmem>>, %arg6: memref<128x128xf32, #tpu.memory_space<vmem>>, %arg7: memref<1x128xf32, #tpu.memory_space<vmem>>, %arg8: memref<128x128xf32, #tpu.memory_space<vmem>>) attributes {dimension_semantics = [#tpu.dimension_semantics<parallel>], iteration_bounds = array<i64: 1>, scalar_prefetch = 0 : i64, scratch_operands = 0 : i64, tpu.core_type = #tpu.core_type<tc>, window_params = [{transform_indices = @transform_0, window_bounds = array<i64: 128, 128>}, {pipeline_mode = #tpu.pipeline_mode<synchronous>, transform_indices = @transform_1, window_bounds = array<i64: 128, 128>}, {pipeline_mode = #tpu.pipeline_mode<synchronous>, transform_indices = @transform_2, window_bounds = array<i64: 1, 128>}, {pipeline_mode = #tpu.pipeline_mode<synchronous>, transform_indices = @transform_3, window_bounds = array<i64: 128, 128>}, {pipeline_mode = #tpu.pipeline_mode<synchronous>, transform_indices = @transform_4, window_bounds = array<i64: 1, 128>}, {pipeline_mode = #tpu.pipeline_mode<synchronous>, transform_indices = @transform_5, window_bounds = array<i64: 128, 128>}, {pipeline_mode = #tpu.pipeline_mode<synchronous>, transform_indices = @transform_6, window_bounds = array<i64: 1, 128>}, {transform_indices = @transform_7, window_bounds = array<i64: 128, 128>}]} {
    %c0 = arith.constant 0 : index
    %c0_0 = arith.constant 0 : index
    %0 = vector.load %arg1[%c0, %c0_0] : memref<128x128xf32, #tpu.memory_space<vmem>>, vector<128x128xf32>
    %c0_1 = arith.constant 0 : index
    %c0_2 = arith.constant 0 : index
    %1 = vector.load %arg2[%c0_1, %c0_2] : memref<128x128xf32, #tpu.memory_space<vmem>>, vector<128x128xf32>
    %cst = arith.constant dense<0.000000e+00> : vector<128x128xf32>
    %2 = tpu.matmul %0, %1, %cst {dimension_numbers = #tpu.dot_dimension_numbers<[1], [0], [0], [1], [0, 0, 1, 1], [], []>} : vector<128x128xf32>, vector<128x128xf32>, vector<128x128xf32> -> vector<128x128xf32>
    %c0_3 = arith.constant 0 : index
    %c0_4 = arith.constant 0 : index
    %3 = vector.load %arg3[%c0_3, %c0_4] : memref<1x128xf32, #tpu.memory_space<vmem>>, vector<1x128xf32>
    %4 = vector.broadcast %3 : vector<1x128xf32> to vector<128x128xf32>
    %5 = arith.addf %2, %4 : vector<128x128xf32>
    %cst_5 = arith.constant 0.000000e+00 : f32
    %6 = vector.broadcast %cst_5 : f32 to vector<128x128xf32>
    %7 = arith.maximumf %5, %6 : vector<128x128xf32>
    %c0_6 = arith.constant 0 : index
    %c0_7 = arith.constant 0 : index
    %8 = vector.load %arg4[%c0_6, %c0_7] : memref<128x128xf32, #tpu.memory_space<vmem>>, vector<128x128xf32>
    %cst_8 = arith.constant dense<0.000000e+00> : vector<128x128xf32>
    %9 = tpu.matmul %7, %8, %cst_8 {dimension_numbers = #tpu.dot_dimension_numbers<[1], [0], [0], [1], [0, 0, 1, 1], [], []>} : vector<128x128xf32>, vector<128x128xf32>, vector<128x128xf32> -> vector<128x128xf32>
    %c0_9 = arith.constant 0 : index
    %c0_10 = arith.constant 0 : index
    %10 = vector.load %arg5[%c0_9, %c0_10] : memref<1x128xf32, #tpu.memory_space<vmem>>, vector<1x128xf32>
    %11 = vector.broadcast %10 : vector<1x128xf32> to vector<128x128xf32>
    %12 = arith.addf %9, %11 : vector<128x128xf32>
    %cst_11 = arith.constant 0.000000e+00 : f32
    %13 = vector.broadcast %cst_11 : f32 to vector<128x128xf32>
    %14 = arith.maximumf %12, %13 : vector<128x128xf32>
    %c0_12 = arith.constant 0 : index
    %c0_13 = arith.constant 0 : index
    %15 = vector.load %arg6[%c0_12, %c0_13] : memref<128x128xf32, #tpu.memory_space<vmem>>, vector<128x128xf32>
    %cst_14 = arith.constant dense<0.000000e+00> : vector<128x128xf32>
    %16 = tpu.matmul %14, %15, %cst_14 {dimension_numbers = #tpu.dot_dimension_numbers<[1], [0], [0], [1], [0, 0, 1, 1], [], []>} : vector<128x128xf32>, vector<128x128xf32>, vector<128x128xf32> -> vector<128x128xf32>
    %c0_15 = arith.constant 0 : index
    %c0_16 = arith.constant 0 : index
    %17 = vector.load %arg7[%c0_15, %c0_16] : memref<1x128xf32, #tpu.memory_space<vmem>>, vector<1x128xf32>
    %18 = vector.broadcast %17 : vector<1x128xf32> to vector<128x128xf32>
    %19 = arith.addf %16, %18 : vector<128x128xf32>
    %cst_17 = arith.constant dense<0xFF800000> : vector<128xf32>
    %20 = vector.multi_reduction <maximumf>, %19, %cst_17 [1] : vector<128x128xf32> to vector<128xf32>
    %21 = vector.shape_cast %20 : vector<128xf32> to vector<128x1xf32>
    %22 = vector.broadcast %21 : vector<128x1xf32> to vector<128x128xf32>
    %23 = arith.subf %19, %22 : vector<128x128xf32>
    %24 = math.exp %23 : vector<128x128xf32>
    %cst_18 = arith.constant dense<0.000000e+00> : vector<128xf32>
    %25 = vector.multi_reduction <add>, %24, %cst_18 [1] : vector<128x128xf32> to vector<128xf32>
    %26 = vector.shape_cast %25 : vector<128xf32> to vector<128x1xf32>
    %27 = math.log %26 : vector<128x1xf32>
    %28 = vector.broadcast %27 : vector<128x1xf32> to vector<128x128xf32>
    %29 = arith.subf %23, %28 : vector<128x128xf32>
    %c0_19 = arith.constant 0 : index
    %c0_20 = arith.constant 0 : index
    %30 = vector.load %arg8[%c0_19, %c0_20] : memref<128x128xf32, #tpu.memory_space<vmem>>, vector<128x128xf32>
    tpu.vector_store %arg8[%c0_19, %c0_20], %29 {strides = array<i32>} : memref<128x128xf32, #tpu.memory_space<vmem>>, vector<128x128xf32>,
    return
  }
  func.func @transform_0(%arg0: i32) -> (i32, i32) {
    %c0_i32 = arith.constant 0 : i32
    %c0_i32_0 = arith.constant 0 : i32
    return %arg0, %c0_i32 : i32, i32
  }
  func.func @transform_1(%arg0: i32) -> (i32, i32) {
    %c0_i32 = arith.constant 0 : i32
    %c0_i32_0 = arith.constant 0 : i32
    %c0_i32_1 = arith.constant 0 : i32
    return %c0_i32, %c0_i32_0 : i32, i32
  }
  func.func @transform_2(%arg0: i32) -> (i32, i32) {
    %c0_i32 = arith.constant 0 : i32
    %c0_i32_0 = arith.constant 0 : i32
    %c0_i32_1 = arith.constant 0 : i32
    return %c0_i32, %c0_i32_0 : i32, i32
  }
  func.func @transform_3(%arg0: i32) -> (i32, i32) {
    %c0_i32 = arith.constant 0 : i32
    %c0_i32_0 = arith.constant 0 : i32
    %c0_i32_1 = arith.constant 0 : i32
    return %c0_i32, %c0_i32_0 : i32, i32
  }
  func.func @transform_4(%arg0: i32) -> (i32, i32) {
    %c0_i32 = arith.constant 0 : i32
    %c0_i32_0 = arith.constant 0 : i32
    %c0_i32_1 = arith.constant 0 : i32
    return %c0_i32, %c0_i32_0 : i32, i32
  }
  func.func @transform_5(%arg0: i32) -> (i32, i32) {
    %c0_i32 = arith.constant 0 : i32
    %c0_i32_0 = arith.constant 0 : i32
    %c0_i32_1 = arith.constant 0 : i32
    return %c0_i32, %c0_i32_0 : i32, i32
  }
  func.func @transform_6(%arg0: i32) -> (i32, i32) {
    %c0_i32 = arith.constant 0 : i32
    %c0_i32_0 = arith.constant 0 : i32
    %c0_i32_1 = arith.constant 0 : i32
    return %c0_i32, %c0_i32_0 : i32, i32
  }
  func.func @transform_7(%arg0: i32) -> (i32, i32) {
    %c0_i32 = arith.constant 0 : i32
    %c0_i32_0 = arith.constant 0 : i32
    return %arg0, %c0_i32 : i32, i32
  }
}

module attributes {stable_mosaic.version = 11 : i64} {
  func.func @probe_kernel(%arg0: i32, %arg1: memref<128x128xf32, #tpu.memory_space<vmem>>, %arg2: memref<128x128xf32, #tpu.memory_space<vmem>>, %arg3: memref<1x128xf32, #tpu.memory_space<vmem>>, %arg4: memref<128x128xf32, #tpu.memory_space<vmem>>, %arg5: memref<1x128xf32, #tpu.memory_space<vmem>>, %arg6: memref<128x128xf32, #tpu.memory_space<vmem>>, %arg7: memref<1x128xf32, #tpu.memory_space<vmem>>, %arg8: memref<128x128xf32, #tpu.memory_space<vmem>>) attributes {dimension_semantics = [#tpu.dimension_semantics<parallel>], iteration_bounds = array<i64: 1>, scalar_prefetch = 0 : i64, scratch_operands = 0 : i64, tpu.core_type = #tpu.core_type<tc>, window_params = [{transform_indices = @transform_0, window_bounds = array<i64: 128, 128>}, {pipeline_mode = #tpu.pipeline_mode<synchronous>, transform_indices = @transform_1, window_bounds = array<i64: 128, 128>}, {pipeline_mode = #tpu.pipeline_mode<synchronous>, transform_indices = @transform_2, window_bounds = array<i64: 1, 128>}, {pipeline_mode = #tpu.pipeline_mode<synchronous>, transform_indices = @transform_3, window_bounds = array<i64: 128, 128>}, {pipeline_mode = #tpu.pipeline_mode<synchronous>, transform_indices = @transform_4, window_bounds = array<i64: 1, 128>}, {pipeline_mode = #tpu.pipeline_mode<synchronous>, transform_indices = @transform_5, window_bounds = array<i64: 128, 128>}, {pipeline_mode = #tpu.pipeline_mode<synchronous>, transform_indices = @transform_6, window_bounds = array<i64: 1, 128>}, {transform_indices = @transform_7, window_bounds = array<i64: 128, 128>}]} {
    %c0 = arith.constant 0 : index
    %c0_0 = arith.constant 0 : index
    %0 = vector.load %arg1[%c0, %c0_0] : memref<128x128xf32, #tpu.memory_space<vmem>>, vector<128x128xf32>
    %c0_1 = arith.constant 0 : index
    %c0_2 = arith.constant 0 : index
    %1 = vector.load %arg2[%c0_1, %c0_2] : memref<128x128xf32, #tpu.memory_space<vmem>>, vector<128x128xf32>
    %cst = arith.constant dense<0.000000e+00> : vector<128x128xf32>
    %2 = tpu.matmul %0, %1, %cst {dimension_numbers = #tpu.dot_dimension_numbers<[1], [0], [0], [1], [0, 0, 1, 1], [], []>} : vector<128x128xf32>, vector<128x128xf32>, vector<128x128xf32> -> vector<128x128xf32>
    %c0_3 = arith.constant 0 : index
    %c0_4 = arith.constant 0 : index
    %3 = vector.load %arg3[%c0_3, %c0_4] : memref<1x128xf32, #tpu.memory_space<vmem>>, vector<1x128xf32>
    %4 = vector.broadcast %3 : vector<1x128xf32> to vector<128x128xf32>
    %5 = arith.addf %2, %4 : vector<128x128xf32>
    %cst_5 = arith.constant 0.000000e+00 : f32
    %6 = vector.broadcast %cst_5 : f32 to vector<128x128xf32>
    %7 = arith.maximumf %5, %6 : vector<128x128xf32>
    %c0_6 = arith.constant 0 : index
    %c0_7 = arith.constant 0 : index
    %8 = vector.load %arg4[%c0_6, %c0_7] : memref<128x128xf32, #tpu.memory_space<vmem>>, vector<128x128xf32>
    %cst_8 = arith.constant dense<0.000000e+00> : vector<128x128xf32>
    %9 = tpu.matmul %7, %8, %cst_8 {dimension_numbers = #tpu.dot_dimension_numbers<[1], [0], [0], [1], [0, 0, 1, 1], [], []>} : vector<128x128xf32>, vector<128x128xf32>, vector<128x128xf32> -> vector<128x128xf32>
    %c0_9 = arith.constant 0 : index
    %c0_10 = arith.constant 0 : index
    %10 = vector.load %arg5[%c0_9, %c0_10] : memref<1x128xf32, #tpu.memory_space<vmem>>, vector<1x128xf32>
    %11 = vector.broadcast %10 : vector<1x128xf32> to vector<128x128xf32>
    %12 = arith.addf %9, %11 : vector<128x128xf32>
    %cst_11 = arith.constant 0.000000e+00 : f32
    %13 = vector.broadcast %cst_11 : f32 to vector<128x128xf32>
    %14 = arith.maximumf %12, %13 : vector<128x128xf32>
    %c0_12 = arith.constant 0 : index
    %c0_13 = arith.constant 0 : index
    %15 = vector.load %arg6[%c0_12, %c0_13] : memref<128x128xf32, #tpu.memory_space<vmem>>, vector<128x128xf32>
    %cst_14 = arith.constant dense<0.000000e+00> : vector<128x128xf32>
    %16 = tpu.matmul %14, %15, %cst_14 {dimension_numbers = #tpu.dot_dimension_numbers<[1], [0], [0], [1], [0, 0, 1, 1], [], []>} : vector<128x128xf32>, vector<128x128xf32>, vector<128x128xf32> -> vector<128x128xf32>
    %c0_15 = arith.constant 0 : index
    %c0_16 = arith.constant 0 : index
    %17 = vector.load %arg7[%c0_15, %c0_16] : memref<1x128xf32, #tpu.memory_space<vmem>>, vector<1x128xf32>
    %18 = vector.broadcast %17 : vector<1x128xf32> to vector<128x128xf32>
    %19 = arith.addf %16, %18 : vector<128x128xf32>
    %cst_17 = arith.constant dense<0xFF800000> : vector<128xf32>
    %20 = vector.multi_reduction <maximumf>, %19, %cst_17 [1] : vector<128x128xf32> to vector<128xf32>
    %21 = vector.shape_cast %20 : vector<128xf32> to vector<128x1xf32>
    %22 = vector.broadcast %21 : vector<128x1xf32> to vector<128x128xf32>
    %23 = arith.subf %19, %22 : vector<128x128xf32>
    %24 = math.exp %23 : vector<128x128xf32>
    %cst_18 = arith.constant dense<0.000000e+00> : vector<128xf32>
    %25 = vector.multi_reduction <add>, %24, %cst_18 [1] : vector<128x128xf32> to vector<128xf32>
    %26 = vector.shape_cast %25 : vector<128xf32> to vector<128x1xf32>
    %27 = math.log %26 : vector<128x1xf32>
    %28 = vector.broadcast %27 : vector<128x1xf32> to vector<128x128xf32>
    %29 = arith.subf %23, %28 : vector<128x128xf32>
    %c0_19 = arith.constant 0 : index
    %c0_20 = arith.constant 0 : index
    %30 = vector.load %arg8[%c0_19, %c0_20] : memref<128x128xf32, #tpu.memory_space<vmem>>, vector<128x128xf32>
    tpu.vector_store %arg8[%c0_19, %c0_20], %29 {strides = array<i32>} : memref<128x128xf32, #tpu.memory_space<vmem>>, vector<128x128xf32>,
    return
  }
  func.func @transform_0(%arg0: i32) -> (i32, i32) {
    %c0_i32 = arith.constant 0 : i32
    %c0_i32_0 = arith.constant 0 : i32
    return %arg0, %c0_i32 : i32, i32
  }
  func.func @transform_1(%arg0: i32) -> (i32, i32) {
    %c0_i32 = arith.constant 0 : i32
    %c0_i32_0 = arith.constant 0 : i32
    %c0_i32_1 = arith.constant 0 : i32
    return %c0_i32, %c0_i32_0 : i32, i32
  }
  func.func @transform_2(%arg0: i32) -> (i32, i32) {
    %c0_i32 = arith.constant 0 : i32
    %c0_i32_0 = arith.constant 0 : i32
    %c0_i32_1 = arith.constant 0 : i32
    return %c0_i32, %c0_i32_0 : i32, i32
  }
  func.func @transform_3(%arg0: i32) -> (i32, i32) {
    %c0_i32 = arith.constant 0 : i32
    %c0_i32_0 = arith.constant 0 : i32
    %c0_i32_1 = arith.constant 0 : i32
    return %c0_i32, %c0_i32_0 : i32, i32
  }
  func.func @transform_4(%arg0: i32) -> (i32, i32) {
    %c0_i32 = arith.constant 0 : i32
    %c0_i32_0 = arith.constant 0 : i32
    %c0_i32_1 = arith.constant 0 : i32
    return %c0_i32, %c0_i32_0 : i32, i32
  }
  func.func @transform_5(%arg0: i32) -> (i32, i32) {
    %c0_i32 = arith.constant 0 : i32
    %c0_i32_0 = arith.constant 0 : i32
    %c0_i32_1 = arith.constant 0 : i32
    return %c0_i32, %c0_i32_0 : i32, i32
  }
  func.func @transform_6(%arg0: i32) -> (i32, i32) {
    %c0_i32 = arith.constant 0 : i32
    %c0_i32_0 = arith.constant 0 : i32
    %c0_i32_1 = arith.constant 0 : i32
    return %c0_i32, %c0_i32_0 : i32, i32
  }
  func.func @transform_7(%arg0: i32) -> (i32, i32) {
    %c0_i32 = arith.constant 0 : i32
    %c0_i32_0 = arith.constant 0 : i32
    return %arg0, %c0_i32 : i32, i32
  }
}

</mosaic_0001>

<bundles_post_ra>
// kernel: tpu_custom_call.1
= control target key start
LH: loop header
LB: loop body
LE: loop exit
PB: predicated region body
PF: predicated region fallthrough
CT: control target
= control target key end

     0   :  { %12 = vsyncpa [#allocation3], 0  ;;  %s1664_s0 = inlined_call_operand.hbm [shape: f32[128,128], index: 0, kind: input, shape index: {}]   ;;  %s1665_s1 = inlined_call_operand.hbm [shape: f32[128,128], index: 1, kind: input, shape index: {}]   ;;  %s1666_s2 = inlined_call_operand.vmem [shape: f32[1,128], index: 2, kind: input, shape index: {}]   ;;  %s1667_s3 = inlined_call_operand.hbm [shape: f32[128,128], index: 3, kind: input, shape index: {}]   ;;  %s1668_s4 = inlined_call_operand.vmem [shape: f32[1,128], index: 4, kind: input, shape index: {}]   ;;  %s1669_s5 = inlined_call_operand.hbm [shape: f32[128,128], index: 5, kind: input, shape index: {}]   ;;  %s1670_s6 = inlined_call_operand.vmem [shape: f32[1,128], index: 6, kind: input, shape index: {}]   ;;  %s1671_s7 = inlined_call_operand.hbm [shape: f32[128,128], index: 7, kind: output, shape index: {}]  }
   0x1   :  { %13 = vsyncpa [#allocation6], 0 }
   0x2   :  { %14 = vsyncpa [#allocation9], 0 }
   0x3   :  { %15 = vsyncpa [#allocation4], 0  ;;  %s1397_s24 = smov [#allocation5]   ;;  %s1398_s26 = smov [#allocation2]  }
   0x4   :  { %s33_s25 = sshll.u32 %s1397_s24, 4  ;;  %s21_s27 = sshll.u32 %s1398_s26, 4  ;;  %s34_s25 = int_to_ptr.vmem [resolvable:$true] %s33_s25  ;;  %s1444_s27 = int_to_ptr.vmem [resolvable:$true] %s21_s27 }
   0x5   :  { %s1279_s30 = scalar_lea.hbm %s1665_s1, 2048 }
   0x6   :  { %p1280_p0 = scmp.ne.s32.totalorder %s1665_s1, %s1279_s30  ;;  %p1283_p1 = scmp.lt.u32.totalorder %s1279_s30, %s1665_s1 }
   0x8   :  { %p1285_p2 = pnand %p1283_p1, %p1280_p0 }
   0xa   :  { %1288 = shalt.err (!%p1285_p2)
}
   0xb   :  { %s1289_s12 = scalar_lea.vmem %s34_s25, 2048  ;;  %p1294_p4 = scmp.lt.s32.totalorder %s34_s25, %s34_s25 }
   0xc   :  { %p1290_p3 = scmp.ne.s32.totalorder %s34_s25, %s1289_s12  ;;  %p1295_p5 = scmp.lt.s32.totalorder %s1289_s12, %s1289_s12 }
   0xe   :  { %p1296_p6 = por %p1295_p5, %p1294_p4 }
  0x10   :  { %p1297_p7 = pnand %p1296_p6, %p1290_p3 }
  0x12   :  { %1300 = shalt.err (!%p1297_p7)
}
  0x13   :  { %s1399_s13 = smov 128   ;;  %s1400_s14 = smov 8  }
  0x14   :  { %39 = dma.hbm_to_vmem [thread:$0]  %s1665_s1, 2048, %s34_s25, [#allocation6], %s1399_s13, %s1399_s13, %s1400_s14  }
  0x15   :  { %s1301_s19 = scalar_lea.hbm %s1664_s0, 2048 }
  0x16   :  { %p1302_p8 = scmp.ne.s32.totalorder %s1664_s0, %s1301_s19  ;;  %p1305_p9 = scmp.lt.u32.totalorder %s1301_s19, %s1664_s0 }
  0x18   :  { %p1307_p10 = pnand %p1305_p9, %p1302_p8 }
  0x1a   :  { %1310 = shalt.err (!%p1307_p10)
}
  0x1b   :  { %s1311_s24 = scalar_lea.vmem %s1444_s27, 2048  ;;  %p1316_p12 = scmp.lt.s32.totalorder %s1444_s27, %s1444_s27 }
  0x1c   :  { %p1312_p11 = scmp.ne.s32.totalorder %s1444_s27, %s1311_s24  ;;  %p1317_p13 = scmp.lt.s32.totalorder %s1311_s24, %s1311_s24 }
  0x1e   :  { %p1318_p0 = por %p1317_p13, %p1316_p12 }
  0x20   :  { %p1319_p1 = pnand %p1318_p0, %p1312_p11 }
  0x22   :  { %1322 = shalt.err (!%p1319_p1)
}
  0x23   :  { %27 = dma.hbm_to_vmem [thread:$0]  %s1664_s0, 2048, %s1444_s27, [#allocation3], %s1399_s13, %s1399_s13, %s1400_s14  }
  0x24   :  { %s1401_s26 = smov [#allocation7]   ;;  %s1402_s29 = smov [#allocation8]  }
  0x25   :  { %s47_s28 = sshll.u32 %s1401_s26, 4  ;;  %s61_s30 = sshll.u32 %s1402_s29, 4  ;;  %s48_s28 = int_to_ptr.vmem [resolvable:$true] %s47_s28  ;;  %s1481_s30 = int_to_ptr.vmem [resolvable:$true] %s61_s30 }
  0x26   :  { %s1323_s10 = scalar_lea.hbm %s1667_s3, 2048 }
  0x27   :  { %p1324_p2 = scmp.ne.s32.totalorder %s1667_s3, %s1323_s10  ;;  %p1327_p3 = scmp.lt.u32.totalorder %s1323_s10, %s1667_s3 }
  0x29   :  { %p1329_p4 = pnand %p1327_p3, %p1324_p2 }
  0x2b   :  { %1332 = shalt.err (!%p1329_p4)
}
  0x2c   :  { %s1333_s0 = scalar_lea.vmem %s48_s28, 2048  ;;  %p1338_p6 = scmp.lt.s32.totalorder %s48_s28, %s48_s28 }
  0x2d   :  { %p1334_p5 = scmp.ne.s32.totalorder %s48_s28, %s1333_s0  ;;  %p1339_p7 = scmp.lt.s32.totalorder %s1333_s0, %s1333_s0 }
  0x2f   :  { %p1340_p8 = por %p1339_p7, %p1338_p6 }
  0x31   :  { %p1341_p9 = pnand %p1340_p8, %p1334_p5 }
  0x33   :  { %1344 = shalt.err (!%p1341_p9)
}
  0x34   :  { %53 = dma.hbm_to_vmem [thread:$0]  %s1667_s3, 2048, %s48_s28, [#allocation6], %s1399_s13, %s1399_s13, %s1400_s14  }
  0x35   :  { %s1345_s20 = scalar_lea.hbm %s1669_s5, 2048 }
  0x36   :  { %p1346_p10 = scmp.ne.s32.totalorder %s1669_s5, %s1345_s20  ;;  %p1349_p11 = scmp.lt.u32.totalorder %s1345_s20, %s1669_s5 }
  0x38   :  { %p1351_p12 = pnand %p1349_p11, %p1346_p10 }
  0x3a   :  { %1354 = shalt.err (!%p1351_p12)
}
  0x3b   :  { %s1355_s1 = scalar_lea.vmem %s1481_s30, 2048  ;;  %p1360_p0 = scmp.lt.s32.totalorder %s1481_s30, %s1481_s30 }
  0x3c   :  { %p1356_p13 = scmp.ne.s32.totalorder %s1481_s30, %s1355_s1  ;;  %p1361_p1 = scmp.lt.s32.totalorder %s1355_s1, %s1355_s1 }
  0x3e   :  { %p1362_p2 = por %p1361_p1, %p1360_p0 }
  0x40   :  { %p1363_p3 = pnand %p1362_p2, %p1356_p13 }
  0x42   :  { %1366 = shalt.err (!%p1363_p3)
}
  0x43   :  { %67 = dma.hbm_to_vmem [thread:$0]  %s1669_s5, 2048, %s1481_s30, [#allocation9], %s1399_s13, %s1399_s13, %s1400_s14  }
  0x44   :  { %1389 = dma.done.wait [#allocation3], 2048  }
  0x45   :  { %1390 = vsyncadd [#allocation3], 4294965248 }
  0x46   :  { %1391 = dma.done.wait [#allocation6], 4096  }
  0x47   :  { %1392 = vsyncadd [#allocation6], 4294963200 }
  0x48   :  { %1393 = dma.done.wait [#allocation9], 2048  }
  0x49   :  { %1394 = vsyncadd [#allocation9], 4294965248  ;;  %v98_v0 = vld [vmem:[#allocation5] sm:$0xff]  ;;  %v99_v1 = vld [vmem:[#allocation5 + $0x8] sm:$0xff] }
  0x4a   :  { %v100_v2 = vld [vmem:[#allocation5 + $0x10] sm:$0xff]  ;;  %v1096_v3 = vpack.c.bf16 %v99_v1, %v98_v0  ;;  %v101_v4 = vld [vmem:[#allocation5 + $0x18] sm:$0xff]  ;;  %v102_v6 = vld [vmem:[#allocation5 + $0x20] sm:$0xff] }
  0x4b   :  { %v1100_v5 = vpack.c.bf16 %v101_v4, %v100_v2  ;;  %v103_v7 = vld [vmem:[#allocation5 + $0x28] sm:$0xff]  ;;  %v82_v9 = vld [vmem:[#allocation2] sm:$0xff]  ;;  %v104_v10 = vld [vmem:[#allocation5 + $0x30] sm:$0xff] }
  0x4c   :  { %1097 = vmatprep.subr.bf16.mxu0 %v1096_v3  ;;  %v1104_v8 = vpack.c.bf16 %v103_v7, %v102_v6  ;;  %v105_v11 = vld [vmem:[#allocation5 + $0x38] sm:$0xff]  ;;  %960 = vmatprep.mubr.f32.mxu0 %v82_v9  ;;  %v106_v13 = vld [vmem:[#allocation5 + $0x40] sm:$0xff]  ;;  %v107_v14 = vld [vmem:[#allocation5 + $0x48] sm:$0xff] }
  0x4d   :  { %1099 = vmatpush3.bf16.msra.mxu0 %v1096_v3  ;;  %v1108_v12 = vpack.c.bf16 %v105_v11, %v104_v10  ;;  %v282_v15 = vld [vmem:[#allocation7] sm:$0xff]  ;;  %v283_v16 = vld [vmem:[#allocation7 + $0x8] sm:$0xff]  ;;  %v284_v17 = vld [vmem:[#allocation7 + $0x10] sm:$0xff]  ;;  %v1112_v21 = vpack.c.bf16 %v107_v14, %v106_v13 }
  0x4e   :  { %1101 = vmatprep.subr.bf16.mxu0 %v1100_v5  ;;  %v285_v18 = vld [vmem:[#allocation7 + $0x18] sm:$0xff]  ;;  %v1128_v19 = vpack.c.bf16 %v283_v16, %v282_v15  ;;  %v286_v22 = vld [vmem:[#allocation7 + $0x20] sm:$0xff]  ;;  %v287_v23 = vld [vmem:[#allocation7 + $0x28] sm:$0xff] }
  0x4f   :  { %v1132_v20 = vpack.c.bf16 %v285_v18, %v284_v17  ;;  %v108_v24 = vld [vmem:[#allocation5 + $0x50] sm:$0xff]  ;;  %v109_v25 = vld [vmem:[#allocation5 + $0x58] sm:$0xff]  ;;  %v1136_v26 = vpack.c.bf16 %v287_v23, %v286_v22  ;;  %v110_v30 = vld [vmem:[#allocation5 + $0x60] sm:$0xff] }
  0x50   :  { %1129 = vmatprep.subr.bf16.mxu1 %v1128_v19  ;;  %v1116_v27 = vpack.c.bf16 %v109_v25, %v108_v24  ;;  %v288_v28 = vld [vmem:[#allocation7 + $0x30] sm:$0xff]  ;;  %v289_v29 = vld [vmem:[#allocation7 + $0x38] sm:$0xff]  ;;  %v111_v31 = vld [vmem:[#allocation5 + $0x68] sm:$0xff] }
  0x51   :  { %1103 = vmatpush3.bf16.msra.mxu0 %v1100_v5  ;;  %1131 = vmatpush3.bf16.msra.mxu1 %v1128_v19  ;;  %v1140_v32 = vpack.c.bf16 %v289_v29, %v288_v28  ;;  %v1120_v33 = vpack.c.bf16 %v111_v31, %v110_v30  ;;  %v290_v34 = vld [vmem:[#allocation7 + $0x40] sm:$0xff]  ;;  %v291_v35 = vld [vmem:[#allocation7 + $0x48] sm:$0xff]  ;;  %v112_v36 = vld [vmem:[#allocation5 + $0x70] sm:$0xff] }
  0x52   :  { %1105 = vmatprep.subr.bf16.mxu0 %v1104_v8  ;;  %1133 = vmatprep.subr.bf16.mxu1 %v1132_v20  ;;  %v113_v37 = vld [vmem:[#allocation5 + $0x78] sm:$0xff]  ;;  %v1144_v38 = vpack.c.bf16 %v291_v35, %v290_v34  ;;  %v292_v40 = vld [vmem:[#allocation7 + $0x50] sm:$0xff]  ;;  %v294_v43 = vld [vmem:[#allocation7 + $0x60] sm:$0xff] }
  0x53   :  { %v1124_v39 = vpack.c.bf16 %v113_v37, %v112_v36  ;;  %v293_v41 = vld [vmem:[#allocation7 + $0x58] sm:$0xff]  ;;  %v295_v44 = vld [vmem:[#allocation7 + $0x68] sm:$0xff]  ;;  %v84_v47 = vld [vmem:[#allocation2 + $0x10] sm:$0xff] }
  0x54   :  { %v1148_v42 = vpack.c.bf16 %v293_v41, %v292_v40  ;;  %v83_v45 = vld [vmem:[#allocation2 + $0x8] sm:$0xff]  ;;  %v1152_v46 = vpack.c.bf16 %v295_v44, %v294_v43  ;;  %v85_v48 = vld [vmem:[#allocation2 + $0x18] sm:$0xff]  ;;  %v86_v49 = vld [vmem:[#allocation2 + $0x20] sm:$0xff] }
  0x55   :  { %1107 = vmatpush3.bf16.msra.mxu0 %v1104_v8  ;;  %1135 = vmatpush3.bf16.msra.mxu1 %v1132_v20  ;;  %v87_v50 = vld [vmem:[#allocation2 + $0x28] sm:$0xff]  ;;  %v88_v51 = vld [vmem:[#allocation2 + $0x30] sm:$0xff]  ;;  %v89_v52 = vld [vmem:[#allocation2 + $0x38] sm:$0xff] }
  0x56   :  { %1109 = vmatprep.subr.bf16.mxu0 %v1108_v12  ;;  %1137 = vmatprep.subr.bf16.mxu1 %v1136_v26  ;;  %v90_v53 = vld [vmem:[#allocation2 + $0x40] sm:$0xff]  ;;  %v91_v54 = vld [vmem:[#allocation2 + $0x48] sm:$0xff]  ;;  %v92_v55 = vld [vmem:[#allocation2 + $0x50] sm:$0xff] }
  0x57   :  { %v93_v56 = vld [vmem:[#allocation2 + $0x58] sm:$0xff]  ;;  %v94_v57 = vld [vmem:[#allocation2 + $0x60] sm:$0xff]  ;;  %v95_v58 = vld [vmem:[#allocation2 + $0x68] sm:$0xff] }
  0x58   :  { %v96_v59 = vld [vmem:[#allocation2 + $0x70] sm:$0xff]  ;;  %v97_v60 = vld [vmem:[#allocation2 + $0x78] sm:$0xff]  ;;  %v466_v0 = vld [vmem:[#allocation8] sm:$0xff] }
  0x59   :  { %1111 = vmatpush3.bf16.msra.mxu0 %v1108_v12  ;;  %1139 = vmatpush3.bf16.msra.mxu1 %v1136_v26  ;;  %v296_v61 = vld [vmem:[#allocation7 + $0x70] sm:$0xff]  ;;  %v297_v62 = vld [vmem:[#allocation7 + $0x78] sm:$0xff]  ;;  %v467_v1 = vld [vmem:[#allocation8 + $0x8] sm:$0xff] }
  0x5a   :  { %1113 = vmatprep.subr.bf16.mxu0 %v1112_v21  ;;  %1141 = vmatprep.subr.bf16.mxu1 %v1140_v32  ;;  %v1156_v63 = vpack.c.bf16 %v297_v62, %v296_v61  ;;  %v468_v2 = vld [vmem:[#allocation8 + $0x10] sm:$0xff]  ;;  %v1160_v3 = vpack.c.bf16 %v467_v1, %v466_v0  ;;  %v469_v4 = vld [vmem:[#allocation8 + $0x18] sm:$0xff]  ;;  %v470_v6 = vld [vmem:[#allocation8 + $0x20] sm:$0xff] }
  0x5b   :  { %v1164_v5 = vpack.c.bf16 %v469_v4, %v468_v2  ;;  %v471_v7 = vld [vmem:[#allocation8 + $0x28] sm:$0xff]  ;;  %v472_v9 = vld [vmem:[#allocation8 + $0x30] sm:$0xff]  ;;  %v473_v10 = vld [vmem:[#allocation8 + $0x38] sm:$0xff] }
  0x5c   :  { %v1168_v8 = vpack.c.bf16 %v471_v7, %v470_v6  ;;  %v1518_v11 = vpack.c.bf16 %v473_v10, %v472_v9  ;;  %v474_v12 = vld [vmem:[#allocation8 + $0x40] sm:$0xff]  ;;  %v475_v13 = vld [vmem:[#allocation8 + $0x48] sm:$0xff]  ;;  %v476_v15 = vld [vmem:[#allocation8 + $0x50] sm:$0xff] }
  0x5d   :  { %1115 = vmatpush3.bf16.msra.mxu0 %v1112_v21  ;;  %1143 = vmatpush3.bf16.msra.mxu1 %v1140_v32  ;;  %v1521_v14 = vpack.c.bf16 %v475_v13, %v474_v12  ;;  %v477_v16 = vld [vmem:[#allocation8 + $0x58] sm:$0xff]  ;;  %v478_v18 = vld [vmem:[#allocation8 + $0x60] sm:$0xff]  ;;  %v479_v19 = vld [vmem:[#allocation8 + $0x68] sm:$0xff] }
  0x5e   :  { %1117 = vmatprep.subr.bf16.mxu0 %v1116_v27  ;;  %1145 = vmatprep.subr.bf16.mxu1 %v1144_v38  ;;  %v1525_v17 = vpack.c.bf16 %v477_v16, %v476_v15  ;;  %v1529_v20 = vpack.c.bf16 %v479_v19, %v478_v18  ;;  %v1537_v21 = vld [vmem:[%s1666_s2] ss:$0 sm:$0xff]  ;;  %v480_v6 = vld [vmem:[#allocation8 + $0x70] sm:$0xff]  ;;  %v481_v7 = vld [vmem:[#allocation8 + $0x78] sm:$0xff] }
  0x5f   :  { %v830_v9 = vld [vmem:[%s1668_s4] ss:$0 sm:$0xff] }
  0x61   :  { %1119 = vmatpush3.bf16.msra.mxu0 %v1116_v27  ;;  %1147 = vmatpush3.bf16.msra.mxu1 %v1144_v38 }
  0x62   :  { %1121 = vmatprep.subr.bf16.mxu0 %v1120_v33  ;;  %1149 = vmatprep.subr.bf16.mxu1 %v1148_v42 }
  0x65   :  { %1123 = vmatpush3.bf16.msra.mxu0 %v1120_v33  ;;  %1151 = vmatpush3.bf16.msra.mxu1 %v1148_v42 }
  0x66   :  { %1125 = vmatprep.subr.bf16.mxu0 %v1124_v39  ;;  %1153 = vmatprep.subr.bf16.mxu1 %v1152_v46 }
  0x69   :  { %1127 = vmatpush3.bf16.msra.mxu0 %v1124_v39  ;;  %1155 = vmatpush3.bf16.msra.mxu1 %v1152_v46 }
  0x6a   :  { %1157 = vmatprep.subr.bf16.mxu1 %v1156_v63  ;;  %1161 = vmatprep.subr.bf16.mxu0 %v1160_v3 }
  0x6c   :  { %961 = vmatmul.mubr.f32.vlgmr.msra.gmra.mrb[0].mxu0 %v83_v45 }
  0x6d   :  { %963 = vmatprep.mubr.f32.mxu0 %v84_v47  ;;  %1159 = vmatpush3.bf16.msra.mxu1 %v1156_v63 }
  0x6e   :  { %1192 = vmatprep.subr.bf16.mxu1 %v1160_v3  ;;  %1163 = vmatpush3.bf16.msra.mxu0 %v1160_v3 }
  0x6f   :  { %1165 = vmatprep.subr.bf16.mxu0 %v1164_v5 }
  0x70   :  { %964 = vmatmul.mubr.f32.gmra.mrb[2].mxu0 %v85_v48 }
  0x71   :  { %966 = vmatprep.mubr.f32.mxu0 %v86_v49 }
  0x72   :  { %1167 = vmatpush3.bf16.msra.mxu0 %v1164_v5 }
  0x73   :  { %1169 = vmatprep.subr.bf16.mxu0 %v1168_v8 }
  0x74   :  { %967 = vmatmul.mubr.f32.gmra.mrb[4].mxu0 %v87_v50 }
  0x75   :  { %969 = vmatprep.mubr.f32.mxu0 %v88_v51 }
  0x76   :  { %1171 = vmatpush3.bf16.msra.mxu0 %v1168_v8 }
  0x77   :  { %1173 = vmatprep.subr.bf16.mxu0 %v1518_v11 }
  0x78   :  { %970 = vmatmul.mubr.f32.gmra.mrb[6].mxu0 %v89_v52 }
  0x79   :  { %972 = vmatprep.mubr.f32.mxu0 %v90_v53 }
  0x7a   :  { %1175 = vmatpush3.bf16.msra.mxu0 %v1518_v11 }
  0x7b   :  { %1177 = vmatprep.subr.bf16.mxu0 %v1521_v14 }
  0x7c   :  { %973 = vmatmul.mubr.f32.gmra.mrb[8].mxu0 %v91_v54 }
  0x7d   :  { %975 = vmatprep.mubr.f32.mxu0 %v92_v55 }
  0x7e   :  { %1179 = vmatpush3.bf16.msra.mxu0 %v1521_v14 }
  0x7f   :  { %1181 = vmatprep.subr.bf16.mxu0 %v1525_v17 }
  0x80   :  { %976 = vmatmul.mubr.f32.gmra.mrb[10].mxu0 %v93_v56 }
  0x81   :  { %978 = vmatprep.mubr.f32.mxu0 %v94_v57 }
  0x82   :  { %1183 = vmatpush3.bf16.msra.mxu0 %v1525_v17 }
  0x83   :  { %1185 = vmatprep.subr.bf16.mxu0 %v1529_v20 }
  0x84   :  { %979 = vmatmul.mubr.f32.gmra.mrb[12].mxu0 %v95_v58 }
  0x85   :  { %981 = vmatprep.mubr.f32.mxu0 %v96_v59 }
  0x86   :  { %1187 = vmatpush3.bf16.msra.mxu0 %v1529_v20 }
  0x88   :  { %982 = vmatmul.mubr.f32.gmra.mrb[14].mxu0 %v97_v60 }
 0x13f   :  { %v962_v22 = vpop.f32.mrb[0].mxu0 }
 0x140   :  { %v193_v23 = vadd.f32 %v962_v22, %v1537_v21  ;;  %v187_v24 = vpop.f32.mrb[1].mxu0 }
 0x141   :  { %v188_v25 = vadd.f32 %v1537_v21, %v187_v24 }
 0x142   :  { %v267_v28 = vmax.f32 %v193_v23, 0.0 }
 0x143   :  { %v965_v26 = vpop.f32.mrb[2].mxu0  ;;  %v266_v27 = vmax.f32 %v188_v25, 0.0 }
 0x144   :  { %v203_v29 = vadd.f32 %v965_v26, %v1537_v21  ;;  %v197_v30 = vpop.f32.mrb[3].mxu0 }
 0x145   :  { %v198_v31 = vadd.f32 %v1537_v21, %v197_v30  ;;  %1016 = vmatprep.mubr.f32.mxu1 %v266_v27 }
 0x146   :  { %1017 = vmatmul.mubr.f32.vlgmr.msra.gmra.mrb[0].mxu1 %v267_v28  ;;  %v269_v34 = vmax.f32 %v203_v29, 0.0 }
 0x147   :  { %v268_v32 = vmax.f32 %v198_v31, 0.0  ;;  %v968_v33 = vpop.f32.mrb[4].mxu0  ;;  %1200 = vmatpush3.bf16.msra.mxu1 %v1160_v3 }
 0x148   :  { %v213_v35 = vadd.f32 %v968_v33, %v1537_v21  ;;  %v207_v36 = vpop.f32.mrb[5].mxu0  ;;  %1193 = vmatprep.subr.bf16.mxu1 %v1164_v5 }
 0x149   :  { %v208_v37 = vadd.f32 %v1537_v21, %v207_v36  ;;  %1019 = vmatprep.mubr.f32.mxu1 %v268_v32 }
 0x14a   :  { %v271_v38 = vmax.f32 %v213_v35, 0.0  ;;  %1020 = vmatmul.mubr.f32.gmra.mrb[2].mxu1 %v269_v34 }
 0x14b   :  { %v270_v39 = vmax.f32 %v208_v37, 0.0  ;;  %v971_v40 = vpop.f32.mrb[6].mxu0  ;;  %1201 = vmatpush3.bf16.msra.mxu1 %v1164_v5 }
 0x14c   :  { %v223_v41 = vadd.f32 %v971_v40, %v1537_v21  ;;  %v217_v42 = vpop.f32.mrb[7].mxu0  ;;  %1194 = vmatprep.subr.bf16.mxu1 %v1168_v8 }
 0x14d   :  { %v218_v43 = vadd.f32 %v1537_v21, %v217_v42  ;;  %1022 = vmatprep.mubr.f32.mxu1 %v270_v39 }
 0x14e   :  { %v273_v44 = vmax.f32 %v223_v41, 0.0  ;;  %1023 = vmatmul.mubr.f32.gmra.mrb[4].mxu1 %v271_v38 }
 0x14f   :  { %v272_v45 = vmax.f32 %v218_v43, 0.0  ;;  %v974_v46 = vpop.f32.mrb[8].mxu0  ;;  %1202 = vmatpush3.bf16.msra.mxu1 %v1168_v8  ;;  %v1188_v8 = vpack.c.bf16 %v481_v7, %v480_v6 }
 0x150   :  { %v233_v47 = vadd.f32 %v974_v46, %v1537_v21  ;;  %v227_v48 = vpop.f32.mrb[9].mxu0  ;;  %1195 = vmatprep.subr.bf16.mxu1 %v1518_v11 }
 0x151   :  { %v228_v49 = vadd.f32 %v1537_v21, %v227_v48  ;;  %1025 = vmatprep.mubr.f32.mxu1 %v272_v45  ;;  %1189 = vmatprep.subr.bf16.mxu0 %v1188_v8 }
 0x152   :  { %v275_v50 = vmax.f32 %v233_v47, 0.0  ;;  %1026 = vmatmul.mubr.f32.gmra.mrb[6].mxu1 %v273_v44  ;;  %1191 = vmatpush3.bf16.msra.mxu0 %v1188_v8 }
 0x153   :  { %v274_v51 = vmax.f32 %v228_v49, 0.0  ;;  %v977_v52 = vpop.f32.mrb[10].mxu0  ;;  %1203 = vmatpush3.bf16.msra.mxu1 %v1518_v11 }
 0x154   :  { %v243_v53 = vadd.f32 %v977_v52, %v1537_v21  ;;  %v237_v54 = vpop.f32.mrb[11].mxu0  ;;  %1196 = vmatprep.subr.bf16.mxu1 %v1521_v14 }
 0x155   :  { %v238_v55 = vadd.f32 %v1537_v21, %v237_v54  ;;  %1028 = vmatprep.mubr.f32.mxu1 %v274_v51 }
 0x156   :  { %v277_v56 = vmax.f32 %v243_v53, 0.0  ;;  %1029 = vmatmul.mubr.f32.gmra.mrb[8].mxu1 %v275_v50 }
 0x157   :  { %v276_v57 = vmax.f32 %v238_v55, 0.0  ;;  %v980_v58 = vpop.f32.mrb[12].mxu0  ;;  %1204 = vmatpush3.bf16.msra.mxu1 %v1521_v14 }
 0x158   :  { %v253_v59 = vadd.f32 %v980_v58, %v1537_v21  ;;  %v247_v60 = vpop.f32.mrb[13].mxu0  ;;  %1197 = vmatprep.subr.bf16.mxu1 %v1525_v17  ;;  %v831_v58 = vld [vmem:[%s1670_s6] ss:$0 sm:$0xff]  ;;  %s1403_s6 = smov [#allocation10]  }
 0x159   :  { %v248_v61 = vadd.f32 %v1537_v21, %v247_v60  ;;  %1031 = vmatprep.mubr.f32.mxu1 %v276_v57  ;;  %s815_s30 = sshll.u32 %s1403_s6, 4  ;;  %s816_s30 = int_to_ptr.vmem [resolvable:$true] %s815_s30 }
 0x15a   :  { %v279_v62 = vmax.f32 %v253_v59, 0.0  ;;  %1032 = vmatmul.mubr.f32.gmra.mrb[10].mxu1 %v277_v56  ;;  %s1367_s8 = scalar_lea.vmem %s816_s30, 2048  ;;  %p1372_p5 = scmp.lt.s32.totalorder %s816_s30, %s816_s30 }
 0x15b   :  { %v278_v63 = vmax.f32 %v248_v61, 0.0  ;;  %v983_v0 = vpop.f32.mrb[14].mxu0  ;;  %1205 = vmatpush3.bf16.msra.mxu1 %v1525_v17  ;;  %p1368_p4 = scmp.ne.s32.totalorder %s816_s30, %s1367_s8  ;;  %p1373_p6 = scmp.lt.s32.totalorder %s1367_s8, %s1367_s8 }
 0x15c   :  { %v263_v1 = vadd.f32 %v983_v0, %v1537_v21  ;;  %v257_v2 = vpop.f32.mrb[15].mxu0  ;;  %1198 = vmatprep.subr.bf16.mxu1 %v1529_v20 }
 0x15d   :  { %v258_v3 = vadd.f32 %v1537_v21, %v257_v2  ;;  %1034 = vmatprep.mubr.f32.mxu1 %v278_v63  ;;  %p1374_p7 = por %p1373_p6, %p1372_p5 }
 0x15e   :  { %v281_v4 = vmax.f32 %v263_v1, 0.0  ;;  %1035 = vmatmul.mubr.f32.gmra.mrb[12].mxu1 %v279_v62 }
 0x15f   :  { %v280_v5 = vmax.f32 %v258_v3, 0.0  ;;  %1206 = vmatpush3.bf16.msra.mxu1 %v1529_v20  ;;  %p1375_p8 = pnand %p1374_p7, %p1368_p4 }
 0x160   :  { %1199 = vmatprep.subr.bf16.mxu1 %v1188_v8 }
 0x161   :  { %1037 = vmatprep.mubr.f32.mxu1 %v280_v5 }
 0x162   :  { %1038 = vmatmul.mubr.f32.gmra.mrb[14].mxu1 %v281_v4 }
 0x163   :  { %1207 = vmatpush3.bf16.msra.mxu1 %v1188_v8 }
 0x219   :  { %v1018_v10 = vpop.f32.mrb[0].mxu1 }
 0x21a   :  { %v377_v11 = vadd.f32 %v1018_v10, %v830_v9  ;;  %v371_v12 = vpop.f32.mrb[1].mxu1 }
 0x21b   :  { %v372_v13 = vadd.f32 %v830_v9, %v371_v12 }
 0x21c   :  { %v451_v16 = vmax.f32 %v377_v11, 0.0 }
 0x21d   :  { %v450_v14 = vmax.f32 %v372_v13, 0.0  ;;  %v1021_v15 = vpop.f32.mrb[2].mxu1 }
 0x21e   :  { %v387_v17 = vadd.f32 %v1021_v15, %v830_v9  ;;  %v381_v18 = vpop.f32.mrb[3].mxu1 }
 0x21f   :  { %v382_v19 = vadd.f32 %v830_v9, %v381_v18  ;;  %1072 = vmatprep.mubr.f32.mxu0 %v450_v14 }
 0x220   :  { %1073 = vmatmul.mubr.f32.vlgmr.msra.gmra.mrb[16].mxu0 %v451_v16  ;;  %v453_v22 = vmax.f32 %v387_v17, 0.0 }
 0x221   :  { %v452_v20 = vmax.f32 %v382_v19, 0.0  ;;  %v1024_v21 = vpop.f32.mrb[4].mxu1 }
 0x222   :  { %v397_v23 = vadd.f32 %v1024_v21, %v830_v9  ;;  %v391_v24 = vpop.f32.mrb[5].mxu1 }
 0x223   :  { %v392_v25 = vadd.f32 %v830_v9, %v391_v24  ;;  %1075 = vmatprep.mubr.f32.mxu0 %v452_v20 }
 0x224   :  { %v455_v26 = vmax.f32 %v397_v23, 0.0  ;;  %1076 = vmatmul.mubr.f32.gmra.mrb[18].mxu0 %v453_v22 }
 0x225   :  { %v454_v27 = vmax.f32 %v392_v25, 0.0  ;;  %v1027_v28 = vpop.f32.mrb[6].mxu1 }
 0x226   :  { %v407_v29 = vadd.f32 %v1027_v28, %v830_v9  ;;  %v401_v30 = vpop.f32.mrb[7].mxu1 }
 0x227   :  { %v402_v31 = vadd.f32 %v830_v9, %v401_v30  ;;  %1078 = vmatprep.mubr.f32.mxu0 %v454_v27 }
 0x228   :  { %v457_v32 = vmax.f32 %v407_v29, 0.0  ;;  %1079 = vmatmul.mubr.f32.gmra.mrb[20].mxu0 %v455_v26 }
 0x229   :  { %v456_v33 = vmax.f32 %v402_v31, 0.0  ;;  %v1030_v34 = vpop.f32.mrb[8].mxu1 }
 0x22a   :  { %v417_v35 = vadd.f32 %v1030_v34, %v830_v9  ;;  %v411_v36 = vpop.f32.mrb[9].mxu1 }
 0x22b   :  { %v412_v37 = vadd.f32 %v830_v9, %v411_v36  ;;  %1081 = vmatprep.mubr.f32.mxu0 %v456_v33 }
 0x22c   :  { %v459_v38 = vmax.f32 %v417_v35, 0.0  ;;  %1082 = vmatmul.mubr.f32.gmra.mrb[22].mxu0 %v457_v32 }
 0x22d   :  { %v458_v39 = vmax.f32 %v412_v37, 0.0  ;;  %v1033_v40 = vpop.f32.mrb[10].mxu1 }
 0x22e   :  { %v427_v41 = vadd.f32 %v1033_v40, %v830_v9  ;;  %v421_v42 = vpop.f32.mrb[11].mxu1 }
 0x22f   :  { %v422_v43 = vadd.f32 %v830_v9, %v421_v42  ;;  %1084 = vmatprep.mubr.f32.mxu1 %v458_v39 }
 0x230   :  { %v461_v44 = vmax.f32 %v427_v41, 0.0  ;;  %1085 = vmatmul.mubr.f32.vlgmr.msra.gmra.mrb[16].mxu1 %v459_v38 }
 0x231   :  { %v460_v45 = vmax.f32 %v422_v43, 0.0  ;;  %v1036_v46 = vpop.f32.mrb[12].mxu1 }
 0x232   :  { %v437_v47 = vadd.f32 %v1036_v46, %v830_v9  ;;  %v431_v48 = vpop.f32.mrb[13].mxu1 }
 0x233   :  { %v432_v49 = vadd.f32 %v830_v9, %v431_v48  ;;  %1087 = vmatprep.mubr.f32.mxu1 %v460_v45 }
 0x234   :  { %v463_v50 = vmax.f32 %v437_v47, 0.0  ;;  %1088 = vmatmul.mubr.f32.gmra.mrb[18].mxu1 %v461_v44 }
 0x235   :  { %v462_v51 = vmax.f32 %v432_v49, 0.0  ;;  %v1039_v52 = vpop.f32.mrb[14].mxu1 }
 0x236   :  { %v447_v53 = vadd.f32 %v1039_v52, %v830_v9  ;;  %v441_v54 = vpop.f32.mrb[15].mxu1 }
 0x237   :  { %v442_v55 = vadd.f32 %v830_v9, %v441_v54  ;;  %1090 = vmatprep.mubr.f32.mxu1 %v462_v51 }
 0x238   :  { %v465_v56 = vmax.f32 %v447_v53, 0.0  ;;  %1091 = vmatmul.mubr.f32.gmra.mrb[20].mxu1 %v463_v50 }
 0x239   :  { %v464_v57 = vmax.f32 %v442_v55, 0.0 }
 0x23b   :  { %1093 = vmatprep.mubr.f32.mxu1 %v464_v57 }
 0x23c   :  { %1094 = vmatmul.mubr.f32.gmra.mrb[22].mxu1 %v465_v56 }
 0x2f3   :  { %v1074_v59 = vpop.f32.mrb[16].mxu0 }
 0x2f4   :  { %v561_v60 = vadd.f32 %v1074_v59, %v831_v58  ;;  %v555_v61 = vpop.f32.mrb[17].mxu0 }
 0x2f5   :  { %v556_v63 = vadd.f32 %v831_v58, %v555_v61 }
 0x2f6   :  { %636 = vmax.xlane.f32.xlu0 %v561_v60 }
 0x2f7   :  { %v1077_v62 = vpop.f32.mrb[18].mxu0 }
 0x2f8   :  { %v571_v0 = vadd.f32 %v1077_v62, %v831_v58  ;;  %v565_v1 = vpop.f32.mrb[19].mxu0 }
 0x2f9   :  { %v566_v3 = vadd.f32 %v831_v58, %v565_v1 }
 0x2fa   :  { %640 = vmax.xlane.f32.xlu1 %v571_v0  ;;  %634 = vmax.xlane.f32.xlu0 %v556_v63 }
 0x2fb   :  { %v1080_v2 = vpop.f32.mrb[20].mxu0 }
 0x2fc   :  { %v575_v4 = vpop.f32.mrb[21].mxu0  ;;  %v581_v7 = vadd.f32 %v1080_v2, %v831_v58 }
 0x2fd   :  { %v576_v5 = vadd.f32 %v831_v58, %v575_v4 }
 0x2fe   :  { %638 = vmax.xlane.f32.xlu1 %v566_v3 }
 0x2ff   :  { %v1083_v6 = vpop.f32.mrb[22].mxu0  ;;  %642 = vmax.xlane.f32.xlu0 %v576_v5 }
 0x300   :  { %v585_v8 = vpop.f32.mrb[23].mxu0  ;;  %v591_v11 = vadd.f32 %v1083_v6, %v831_v58 }
 0x301   :  { %v586_v9 = vadd.f32 %v831_v58, %v585_v8 }
 0x302   :  { %644 = vmax.xlane.f32.xlu1 %v581_v7 }
 0x303   :  { %v1086_v10 = vpop.f32.mrb[16].mxu1  ;;  %646 = vmax.xlane.f32.xlu0 %v586_v9 }
 0x304   :  { %v595_v12 = vpop.f32.mrb[17].mxu1  ;;  %v601_v15 = vadd.f32 %v1086_v10, %v831_v58 }
 0x305   :  { %v596_v13 = vadd.f32 %v831_v58, %v595_v12 }
 0x306   :  { %648 = vmax.xlane.f32.xlu1 %v591_v11 }
 0x307   :  { %v1089_v14 = vpop.f32.mrb[18].mxu1  ;;  %650 = vmax.xlane.f32.xlu0 %v596_v13 }
 0x308   :  { %v605_v16 = vpop.f32.mrb[19].mxu1  ;;  %v611_v19 = vadd.f32 %v1089_v14, %v831_v58 }
 0x309   :  { %v606_v17 = vadd.f32 %v831_v58, %v605_v16 }
 0x30a   :  { %652 = vmax.xlane.f32.xlu1 %v601_v15 }
 0x30b   :  { %v1092_v18 = vpop.f32.mrb[20].mxu1  ;;  %654 = vmax.xlane.f32.xlu0 %v606_v17 }
 0x30c   :  { %v615_v20 = vpop.f32.mrb[21].mxu1  ;;  %v1572_v23 = vadd.f32 %v1092_v18, %v831_v58 }
 0x30d   :  { %v1569_v21 = vadd.f32 %v831_v58, %v615_v20 }
 0x30e   :  { %656 = vmax.xlane.f32.xlu1 %v611_v19 }
 0x30f   :  { %v1095_v22 = vpop.f32.mrb[22].mxu1  ;;  %658 = vmax.xlane.f32.xlu0 %v1569_v21 }
 0x310   :  { %v625_v24 = vpop.f32.mrb[23].mxu1  ;;  %v1578_v26 = vadd.f32 %v1095_v22, %v831_v58 }
 0x311   :  { %v1574_v25 = vadd.f32 %v831_v58, %v625_v24 }
 0x312   :  { %660 = vmax.xlane.f32.xlu1 %v1572_v23 }
 0x313   :  { %662 = vmax.xlane.f32.xlu0 %v1574_v25 }
 0x316   :  { %664 = vmax.xlane.f32.xlu1 %v1578_v26 }
 0x383   :  { %v637_v27 = vpop.xlane.xlu0 %636 }
 0x384   :  { %v1581_v28 = vsub.f32 %v561_v60, %v637_v27 }
 0x386   :  { %v684_v29 = vmul.f32 1.442695, %v1581_v28 }
 0x387   :  { %v641_v30 = vpop.xlane.xlu1 %640  ;;  %v635_v31 = vpop.xlane.xlu0 %634 }
 0x388   :  { %1215 = vpow2.f32 %v684_v29  ;;  %v1584_v32 = vsub.f32 %v571_v0, %v641_v30  ;;  %v1586_v33 = vsub.f32 %v556_v63, %v635_v31 }
 0x38a   :  { %v688_v34 = vmul.f32 1.442695, %v1584_v32  ;;  %v682_v35 = vmul.f32 1.442695, %v1586_v33 }
 0x38b   :  { %v639_v36 = vpop.xlane.xlu1 %638 }
 0x38c   :  { %1217 = vpow2.f32 %v688_v34  ;;  %v1590_v37 = vsub.f32 %v566_v3, %v639_v36  ;;  %v643_v38 = vpop.xlane.xlu0 %642 }
 0x38d   :  { %1219 = vpow2.f32 %v682_v35  ;;  %v1592_v39 = vsub.f32 %v576_v5, %v643_v38 }
 0x38e   :  { %v686_v40 = vmul.f32 1.442695, %v1590_v37 }
 0x38f   :  { %v645_v41 = vpop.xlane.xlu1 %644  ;;  %v690_v44 = vmul.f32 1.442695, %v1592_v39 }
 0x390   :  { %1221 = vpow2.f32 %v686_v40  ;;  %v1595_v42 = vsub.f32 %v581_v7, %v645_v41  ;;  %v647_v43 = vpop.xlane.xlu0 %646 }
 0x391   :  { %v1598_v45 = vsub.f32 %v586_v9, %v647_v43 }
 0x392   :  { %v1216_v46 = vpop.eup %1215  ;;  %v692_v47 = vmul.f32 1.442695, %v1595_v42 }
 0x393   :  { %716 = vadd.xlane.f32.xlu1 %v1216_v46  ;;  %v649_v48 = vpop.xlane.xlu1 %648  ;;  %v694_v51 = vmul.f32 1.442695, %v1598_v45 }
 0x394   :  { %1223 = vpow2.f32 %v692_v47  ;;  %v1601_v49 = vsub.f32 %v591_v11, %v649_v48  ;;  %v651_v50 = vpop.xlane.xlu0 %650 }
 0x395   :  { %1225 = vpow2.f32 %v690_v44  ;;  %v1604_v52 = vsub.f32 %v596_v13, %v651_v50 }
 0x396   :  { %v1218_v53 = vpop.eup %1217  ;;  %v696_v54 = vmul.f32 1.442695, %v1601_v49 }
 0x397   :  { %v1220_v55 = vpop.eup %1219  ;;  %720 = vadd.xlane.f32.xlu1 %v1218_v53  ;;  %v653_v56 = vpop.xlane.xlu1 %652  ;;  %v698_v59 = vmul.f32 1.442695, %v1604_v52 }
 0x398   :  { %1227 = vpow2.f32 %v696_v54  ;;  %v1607_v57 = vsub.f32 %v601_v15, %v653_v56  ;;  %714 = vadd.xlane.f32.xlu0 %v1220_v55  ;;  %v655_v58 = vpop.xlane.xlu0 %654 }
 0x399   :  { %1229 = vpow2.f32 %v694_v51  ;;  %v1610_v60 = vsub.f32 %v606_v17, %v655_v58 }
 0x39a   :  { %v1222_v61 = vpop.eup %1221  ;;  %v700_v62 = vmul.f32 1.442695, %v1607_v57 }
 0x39b   :  { %v657_v63 = vpop.xlane.xlu1 %656  ;;  %v702_v2 = vmul.f32 1.442695, %v1610_v60 }
 0x39c   :  { %1231 = vpow2.f32 %v700_v62  ;;  %v1613_v0 = vsub.f32 %v611_v19, %v657_v63  ;;  %718 = vadd.xlane.f32.xlu0 %v1222_v61  ;;  %v659_v1 = vpop.xlane.xlu0 %658 }
 0x39d   :  { %1233 = vpow2.f32 %v698_v59  ;;  %v1617_v3 = vsub.f32 %v1569_v21, %v659_v1 }
 0x39e   :  { %v1224_v4 = vpop.eup %1223  ;;  %v704_v5 = vmul.f32 1.442695, %v1613_v0 }
 0x39f   :  { %v1226_v6 = vpop.eup %1225  ;;  %724 = vadd.xlane.f32.xlu1 %v1224_v4  ;;  %v661_v7 = vpop.xlane.xlu1 %660  ;;  %v706_v10 = vmul.f32 1.442695, %v1617_v3 }
 0x3a0   :  { %1235 = vpow2.f32 %v704_v5  ;;  %v1621_v8 = vsub.f32 %v1572_v23, %v661_v7  ;;  %722 = vadd.xlane.f32.xlu0 %v1226_v6  ;;  %v663_v9 = vpop.xlane.xlu0 %662 }
 0x3a1   :  { %1237 = vpow2.f32 %v702_v2  ;;  %v1625_v11 = vsub.f32 %v1574_v25, %v663_v9 }
 0x3a2   :  { %v1228_v12 = vpop.eup %1227  ;;  %v708_v13 = vmul.f32 1.442695, %v1621_v8 }
 0x3a3   :  { %v1230_v14 = vpop.eup %1229  ;;  %728 = vadd.xlane.f32.xlu1 %v1228_v12  ;;  %v665_v15 = vpop.xlane.xlu1 %664  ;;  %v710_v17 = vmul.f32 1.442695, %v1625_v11 }
 0x3a4   :  { %1239 = vpow2.f32 %v708_v13  ;;  %v1629_v16 = vsub.f32 %v1578_v26, %v665_v15  ;;  %726 = vadd.xlane.f32.xlu0 %v1230_v14 }
 0x3a5   :  { %1241 = vpow2.f32 %v706_v10 }
 0x3a6   :  { %v1232_v18 = vpop.eup %1231  ;;  %v712_v19 = vmul.f32 1.442695, %v1629_v16 }
 0x3a7   :  { %v1234_v20 = vpop.eup %1233  ;;  %732 = vadd.xlane.f32.xlu1 %v1232_v18 }
 0x3a8   :  { %1243 = vpow2.f32 %v712_v19  ;;  %730 = vadd.xlane.f32.xlu0 %v1234_v20 }
 0x3a9   :  { %1245 = vpow2.f32 %v710_v17 }
 0x3aa   :  { %v1236_v21 = vpop.eup %1235 }
 0x3ab   :  { %v1238_v22 = vpop.eup %1237  ;;  %736 = vadd.xlane.f32.xlu1 %v1236_v21 }
 0x3ac   :  { %734 = vadd.xlane.f32.xlu0 %v1238_v22 }
 0x3ae   :  { %v1240_v23 = vpop.eup %1239 }
 0x3af   :  { %v1242_v24 = vpop.eup %1241  ;;  %740 = vadd.xlane.f32.xlu1 %v1240_v23 }
 0x3b0   :  { %738 = vadd.xlane.f32.xlu0 %v1242_v24 }
 0x3b2   :  { %v1244_v25 = vpop.eup %1243 }
 0x3b3   :  { %v1246_v26 = vpop.eup %1245  ;;  %744 = vadd.xlane.f32.xlu1 %v1244_v25 }
 0x3b4   :  { %742 = vadd.xlane.f32.xlu0 %v1246_v26 }
 0x420   :  { %v717_v27 = vpop.xlane.xlu1 %716 }
 0x421   :  { %1247 = vlog2.f32 %v717_v27 }
 0x424   :  { %v721_v29 = vpop.xlane.xlu1 %720 }
 0x425   :  { %1249 = vlog2.f32 %v721_v29  ;;  %v715_v30 = vpop.xlane.xlu0 %714 }
 0x426   :  { %1251 = vlog2.f32 %v715_v30 }
 0x429   :  { %v719_v31 = vpop.xlane.xlu0 %718 }
 0x42a   :  { %1253 = vlog2.f32 %v719_v31 }
 0x42b   :  { %v1248_v34 = vpop.eup %1247 }
 0x42c   :  { %v749_v35 = vmul.f32 0.6931472, %v1248_v34  ;;  %v725_v36 = vpop.xlane.xlu1 %724 }
 0x42d   :  { %1255 = vlog2.f32 %v725_v36  ;;  %v723_v38 = vpop.xlane.xlu0 %722 }
 0x42e   :  { %v779_v40 = vsub.f32 %v1581_v28, %v749_v35  ;;  %1257 = vlog2.f32 %v723_v38 }
 0x42f   :  { %v1250_v41 = vpop.eup %1249 }
 0x430   :  { %v1252_v43 = vpop.eup %1251  ;;  %795 = vst [vmem:[#allocation10 + $0x8] sm:$0xff] %v779_v40  ;;  %v753_v44 = vmul.f32 0.6931472, %v1250_v41  ;;  %v729_v46 = vpop.xlane.xlu1 %728 }
 0x431   :  { %v747_v47 = vmul.f32 0.6931472, %v1252_v43  ;;  %1259 = vlog2.f32 %v729_v46  ;;  %v727_v48 = vpop.xlane.xlu0 %726 }
 0x432   :  { %v781_v50 = vsub.f32 %v1584_v32, %v753_v44  ;;  %1261 = vlog2.f32 %v727_v48 }
 0x433   :  { %v778_v51 = vsub.f32 %v1586_v33, %v747_v47 }
 0x434   :  { %v1254_v53 = vpop.eup %1253  ;;  %797 = vst [vmem:[#allocation10 + $0x18] sm:$0xff] %v781_v50  ;;  %v733_v54 = vpop.xlane.xlu1 %732 }
 0x435   :  { %794 = vst [vmem:[#allocation10] sm:$0xff] %v778_v51  ;;  %v751_v55 = vmul.f32 0.6931472, %v1254_v53  ;;  %1263 = vlog2.f32 %v733_v54  ;;  %v731_v28 = vpop.xlane.xlu0 %730 }
 0x436   :  { %1265 = vlog2.f32 %v731_v28 }
 0x437   :  { %v1256_v56 = vpop.eup %1255  ;;  %v780_v58 = vsub.f32 %v1590_v37, %v751_v55 }
 0x438   :  { %v1258_v59 = vpop.eup %1257  ;;  %v757_v61 = vmul.f32 0.6931472, %v1256_v56  ;;  %v737_v62 = vpop.xlane.xlu1 %736 }
 0x439   :  { %796 = vst [vmem:[#allocation10 + $0x10] sm:$0xff] %v780_v58  ;;  %v755_v63 = vmul.f32 0.6931472, %v1258_v59  ;;  %1267 = vlog2.f32 %v737_v62  ;;  %v735_v32 = vpop.xlane.xlu0 %734 }
 0x43a   :  { %v783_v33 = vsub.f32 %v1595_v42, %v757_v61  ;;  %1269 = vlog2.f32 %v735_v32 }
 0x43b   :  { %v1260_v1 = vpop.eup %1259  ;;  %v782_v2 = vsub.f32 %v1592_v39, %v755_v63 }
 0x43c   :  { %v1262_v4 = vpop.eup %1261  ;;  %799 = vst [vmem:[#allocation10 + $0x28] sm:$0xff] %v783_v33  ;;  %v761_v5 = vmul.f32 0.6931472, %v1260_v1  ;;  %v741_v6 = vpop.xlane.xlu1 %740 }
 0x43d   :  { %798 = vst [vmem:[#allocation10 + $0x20] sm:$0xff] %v782_v2  ;;  %v759_v7 = vmul.f32 0.6931472, %v1262_v4  ;;  %1271 = vlog2.f32 %v741_v6  ;;  %v739_v37 = vpop.xlane.xlu0 %738 }
 0x43e   :  { %v785_v9 = vsub.f32 %v1601_v49, %v761_v5  ;;  %1273 = vlog2.f32 %v739_v37 }
 0x43f   :  { %v1264_v10 = vpop.eup %1263  ;;  %v784_v12 = vsub.f32 %v1598_v45, %v759_v7 }
 0x440   :  { %v1266_v13 = vpop.eup %1265  ;;  %801 = vst [vmem:[#allocation10 + $0x38] sm:$0xff] %v785_v9  ;;  %v765_v42 = vmul.f32 0.6931472, %v1264_v10  ;;  %v745_v14 = vpop.xlane.xlu1 %744 }
 0x441   :  { %800 = vst [vmem:[#allocation10 + $0x30] sm:$0xff] %v784_v12  ;;  %v763_v39 = vmul.f32 0.6931472, %v1266_v13  ;;  %1275 = vlog2.f32 %v745_v14  ;;  %v743_v15 = vpop.xlane.xlu0 %742 }
 0x442   :  { %v787_v17 = vsub.f32 %v1607_v57, %v765_v42  ;;  %1277 = vlog2.f32 %v743_v15 }
 0x443   :  { %v1268_v18 = vpop.eup %1267  ;;  %v786_v19 = vsub.f32 %v1604_v52, %v763_v39 }
 0x444   :  { %v1270_v20 = vpop.eup %1269  ;;  %803 = vst [vmem:[#allocation10 + $0x48] sm:$0xff] %v787_v17  ;;  %v769_v49 = vmul.f32 0.6931472, %v1268_v18 }
 0x445   :  { %802 = vst [vmem:[#allocation10 + $0x40] sm:$0xff] %v786_v19  ;;  %v767_v21 = vmul.f32 0.6931472, %v1270_v20 }
 0x446   :  { %v789_v45 = vsub.f32 %v1613_v0, %v769_v49 }
 0x447   :  { %v1272_v22 = vpop.eup %1271  ;;  %v788_v23 = vsub.f32 %v1610_v60, %v767_v21 }
 0x448   :  { %v1274_v24 = vpop.eup %1273  ;;  %805 = vst [vmem:[#allocation10 + $0x58] sm:$0xff] %v789_v45  ;;  %v773_v25 = vmul.f32 0.6931472, %v1272_v22 }
 0x449   :  { %804 = vst [vmem:[#allocation10 + $0x50] sm:$0xff] %v788_v23  ;;  %v771_v26 = vmul.f32 0.6931472, %v1274_v24 }
 0x44a   :  { %v791_v57 = vsub.f32 %v1621_v8, %v773_v25 }
 0x44b   :  { %v1276_v27 = vpop.eup %1275  ;;  %v790_v52 = vsub.f32 %v1617_v3, %v771_v26 }
 0x44c   :  { %v1278_v29 = vpop.eup %1277  ;;  %807 = vst [vmem:[#allocation10 + $0x68] sm:$0xff] %v791_v57  ;;  %v777_v30 = vmul.f32 0.6931472, %v1276_v27 }
 0x44d   :  { %806 = vst [vmem:[#allocation10 + $0x60] sm:$0xff] %v790_v52  ;;  %v775_v0 = vmul.f32 0.6931472, %v1278_v29 }
 0x44e   :  { %v793_v31 = vsub.f32 %v1629_v16, %v777_v30 }
 0x44f   :  { %v792_v60 = vsub.f32 %v1625_v11, %v775_v0 }
 0x450   :  { %809 = vst [vmem:[#allocation10 + $0x78] sm:$0xff] %v793_v31 }
 0x451   :  { %808 = vst [vmem:[#allocation10 + $0x70] sm:$0xff] %v792_v60 }
 0x452   :  { %1378 = shalt.err (!%p1375_p8)
}
 0x453   :  { %s1379_s11 = scalar_lea.hbm %s1671_s7, 2048 }
 0x454   :  { %p1380_p9 = scmp.ne.s32.totalorder %s1671_s7, %s1379_s11  ;;  %p1383_p10 = scmp.lt.u32.totalorder %s1379_s11, %s1671_s7 }
 0x456   :  { %p1385_p11 = pnand %p1383_p10, %p1380_p9 }
 0x458   :  { %1388 = shalt.err (!%p1385_p11)
}
 0x459   :  { %821 = dma.vmem_to_hbm [thread:$0]  %s816_s30, 2048, %s1671_s7, [#allocation4], %s1399_s13, %s1399_s13, %s1400_s14  }
 0x45a   :  { %1395 = dma.done.wait [#allocation4], 2048  }
 0x45b   :  { %1396 = vsyncadd [#allocation4], 4294965248 }
 0x45c   :  { %825 = vsyncpa [#allocation3], 1 }
 0x45d   :  { %826 = vsyncpa [#allocation6], 1 }
 0x45e   :  { %827 = vsyncpa [#allocation9], 1 }
 0x45f   :  { %828 = vsyncpa [#allocation4], 1 }

// kernel: tpu_custom_call.1
= control target key start
LH: loop header
LB: loop body
LE: loop exit
PB: predicated region body
PF: predicated region fallthrough
CT: control target
= control target key end

     0   :  { %12 = vsyncpa [#allocation3], 0  ;;  %s1664_s0 = inlined_call_operand.hbm [shape: f32[128,128], index: 0, kind: input, shape index: {}]   ;;  %s1665_s1 = inlined_call_operand.hbm [shape: f32[128,128], index: 1, kind: input, shape index: {}]   ;;  %s1666_s2 = inlined_call_operand.vmem [shape: f32[1,128], index: 2, kind: input, shape index: {}]   ;;  %s1667_s3 = inlined_call_operand.hbm [shape: f32[128,128], index: 3, kind: input, shape index: {}]   ;;  %s1668_s4 = inlined_call_operand.vmem [shape: f32[1,128], index: 4, kind: input, shape index: {}]   ;;  %s1669_s5 = inlined_call_operand.hbm [shape: f32[128,128], index: 5, kind: input, shape index: {}]   ;;  %s1670_s6 = inlined_call_operand.vmem [shape: f32[1,128], index: 6, kind: input, shape index: {}]   ;;  %s1671_s7 = inlined_call_operand.hbm [shape: f32[128,128], index: 7, kind: output, shape index: {}]  }
   0x1   :  { %13 = vsyncpa [#allocation6], 0 }
   0x2   :  { %14 = vsyncpa [#allocation9], 0 }
   0x3   :  { %15 = vsyncpa [#allocation4], 0  ;;  %s1397_s24 = smov [#allocation5]   ;;  %s1398_s26 = smov [#allocation2]  }
   0x4   :  { %s33_s25 = sshll.u32 %s1397_s24, 4  ;;  %s21_s27 = sshll.u32 %s1398_s26, 4  ;;  %s34_s25 = int_to_ptr.vmem [resolvable:$true] %s33_s25  ;;  %s1444_s27 = int_to_ptr.vmem [resolvable:$true] %s21_s27 }
   0x5   :  { %s1279_s30 = scalar_lea.hbm %s1665_s1, 2048 }
   0x6   :  { %p1280_p0 = scmp.ne.s32.totalorder %s1665_s1, %s1279_s30  ;;  %p1283_p1 = scmp.lt.u32.totalorder %s1279_s30, %s1665_s1 }
   0x8   :  { %p1285_p2 = pnand %p1283_p1, %p1280_p0 }
   0xa   :  { %1288 = shalt.err (!%p1285_p2)
}
   0xb   :  { %s1289_s12 = scalar_lea.vmem %s34_s25, 2048  ;;  %p1294_p4 = scmp.lt.s32.totalorder %s34_s25, %s34_s25 }
   0xc   :  { %p1290_p3 = scmp.ne.s32.totalorder %s34_s25, %s1289_s12  ;;  %p1295_p5 = scmp.lt.s32.totalorder %s1289_s12, %s1289_s12 }
   0xe   :  { %p1296_p6 = por %p1295_p5, %p1294_p4 }
  0x10   :  { %p1297_p7 = pnand %p1296_p6, %p1290_p3 }
  0x12   :  { %1300 = shalt.err (!%p1297_p7)
}
  0x13   :  { %s1399_s13 = smov 128   ;;  %s1400_s14 = smov 8  }
  0x14   :  { %39 = dma.hbm_to_vmem [thread:$0]  %s1665_s1, 2048, %s34_s25, [#allocation6], %s1399_s13, %s1399_s13, %s1400_s14  }
  0x15   :  { %s1301_s19 = scalar_lea.hbm %s1664_s0, 2048 }
  0x16   :  { %p1302_p8 = scmp.ne.s32.totalorder %s1664_s0, %s1301_s19  ;;  %p1305_p9 = scmp.lt.u32.totalorder %s1301_s19, %s1664_s0 }
  0x18   :  { %p1307_p10 = pnand %p1305_p9, %p1302_p8 }
  0x1a   :  { %1310 = shalt.err (!%p1307_p10)
}
  0x1b   :  { %s1311_s24 = scalar_lea.vmem %s1444_s27, 2048  ;;  %p1316_p12 = scmp.lt.s32.totalorder %s1444_s27, %s1444_s27 }
  0x1c   :  { %p1312_p11 = scmp.ne.s32.totalorder %s1444_s27, %s1311_s24  ;;  %p1317_p13 = scmp.lt.s32.totalorder %s1311_s24, %s1311_s24 }
  0x1e   :  { %p1318_p0 = por %p1317_p13, %p1316_p12 }
  0x20   :  { %p1319_p1 = pnand %p1318_p0, %p1312_p11 }
  0x22   :  { %1322 = shalt.err (!%p1319_p1)
}
  0x23   :  { %27 = dma.hbm_to_vmem [thread:$0]  %s1664_s0, 2048, %s1444_s27, [#allocation3], %s1399_s13, %s1399_s13, %s1400_s14  }
  0x24   :  { %s1401_s26 = smov [#allocation7]   ;;  %s1402_s29 = smov [#allocation8]  }
  0x25   :  { %s47_s28 = sshll.u32 %s1401_s26, 4  ;;  %s61_s30 = sshll.u32 %s1402_s29, 4  ;;  %s48_s28 = int_to_ptr.vmem [resolvable:$true] %s47_s28  ;;  %s1481_s30 = int_to_ptr.vmem [resolvable:$true] %s61_s30 }
  0x26   :  { %s1323_s10 = scalar_lea.hbm %s1667_s3, 2048 }
  0x27   :  { %p1324_p2 = scmp.ne.s32.totalorder %s1667_s3, %s1323_s10  ;;  %p1327_p3 = scmp.lt.u32.totalorder %s1323_s10, %s1667_s3 }
  0x29   :  { %p1329_p4 = pnand %p1327_p3, %p1324_p2 }
  0x2b   :  { %1332 = shalt.err (!%p1329_p4)
}
  0x2c   :  { %s1333_s0 = scalar_lea.vmem %s48_s28, 2048  ;;  %p1338_p6 = scmp.lt.s32.totalorder %s48_s28, %s48_s28 }
  0x2d   :  { %p1334_p5 = scmp.ne.s32.totalorder %s48_s28, %s1333_s0  ;;  %p1339_p7 = scmp.lt.s32.totalorder %s1333_s0, %s1333_s0 }
  0x2f   :  { %p1340_p8 = por %p1339_p7, %p1338_p6 }
  0x31   :  { %p1341_p9 = pnand %p1340_p8, %p1334_p5 }
  0x33   :  { %1344 = shalt.err (!%p1341_p9)
}
  0x34   :  { %53 = dma.hbm_to_vmem [thread:$0]  %s1667_s3, 2048, %s48_s28, [#allocation6], %s1399_s13, %s1399_s13, %s1400_s14  }
  0x35   :  { %s1345_s20 = scalar_lea.hbm %s1669_s5, 2048 }
  0x36   :  { %p1346_p10 = scmp.ne.s32.totalorder %s1669_s5, %s1345_s20  ;;  %p1349_p11 = scmp.lt.u32.totalorder %s1345_s20, %s1669_s5 }
  0x38   :  { %p1351_p12 = pnand %p1349_p11, %p1346_p10 }
  0x3a   :  { %1354 = shalt.err (!%p1351_p12)
}
  0x3b   :  { %s1355_s1 = scalar_lea.vmem %s1481_s30, 2048  ;;  %p1360_p0 = scmp.lt.s32.totalorder %s1481_s30, %s1481_s30 }
  0x3c   :  { %p1356_p13 = scmp.ne.s32.totalorder %s1481_s30, %s1355_s1  ;;  %p1361_p1 = scmp.lt.s32.totalorder %s1355_s1, %s1355_s1 }
  0x3e   :  { %p1362_p2 = por %p1361_p1, %p1360_p0 }
  0x40   :  { %p1363_p3 = pnand %p1362_p2, %p1356_p13 }
  0x42   :  { %1366 = shalt.err (!%p1363_p3)
}
  0x43   :  { %67 = dma.hbm_to_vmem [thread:$0]  %s1669_s5, 2048, %s1481_s30, [#allocation9], %s1399_s13, %s1399_s13, %s1400_s14  }
  0x44   :  { %1389 = dma.done.wait [#allocation3], 2048  }
  0x45   :  { %1390 = vsyncadd [#allocation3], 4294965248 }
  0x46   :  { %1391 = dma.done.wait [#allocation6], 4096  }
  0x47   :  { %1392 = vsyncadd [#allocation6], 4294963200 }
  0x48   :  { %1393 = dma.done.wait [#allocation9], 2048  }
  0x49   :  { %1394 = vsyncadd [#allocation9], 4294965248  ;;  %v98_v0 = vld [vmem:[#allocation5] sm:$0xff]  ;;  %v99_v1 = vld [vmem:[#allocation5 + $0x8] sm:$0xff] }
  0x4a   :  { %v100_v2 = vld [vmem:[#allocation5 + $0x10] sm:$0xff]  ;;  %v1096_v3 = vpack.c.bf16 %v99_v1, %v98_v0  ;;  %v101_v4 = vld [vmem:[#allocation5 + $0x18] sm:$0xff]  ;;  %v102_v6 = vld [vmem:[#allocation5 + $0x20] sm:$0xff] }
  0x4b   :  { %v1100_v5 = vpack.c.bf16 %v101_v4, %v100_v2  ;;  %v103_v7 = vld [vmem:[#allocation5 + $0x28] sm:$0xff]  ;;  %v82_v9 = vld [vmem:[#allocation2] sm:$0xff]  ;;  %v104_v10 = vld [vmem:[#allocation5 + $0x30] sm:$0xff] }
  0x4c   :  { %1097 = vmatprep.subr.bf16.mxu0 %v1096_v3  ;;  %v1104_v8 = vpack.c.bf16 %v103_v7, %v102_v6  ;;  %v105_v11 = vld [vmem:[#allocation5 + $0x38] sm:$0xff]  ;;  %960 = vmatprep.mubr.f32.mxu0 %v82_v9  ;;  %v106_v13 = vld [vmem:[#allocation5 + $0x40] sm:$0xff]  ;;  %v107_v14 = vld [vmem:[#allocation5 + $0x48] sm:$0xff] }
  0x4d   :  { %1099 = vmatpush3.bf16.msra.mxu0 %v1096_v3  ;;  %v1108_v12 = vpack.c.bf16 %v105_v11, %v104_v10  ;;  %v282_v15 = vld [vmem:[#allocation7] sm:$0xff]  ;;  %v283_v16 = vld [vmem:[#allocation7 + $0x8] sm:$0xff]  ;;  %v284_v17 = vld [vmem:[#allocation7 + $0x10] sm:$0xff]  ;;  %v1112_v21 = vpack.c.bf16 %v107_v14, %v106_v13 }
  0x4e   :  { %1101 = vmatprep.subr.bf16.mxu0 %v1100_v5  ;;  %v285_v18 = vld [vmem:[#allocation7 + $0x18] sm:$0xff]  ;;  %v1128_v19 = vpack.c.bf16 %v283_v16, %v282_v15  ;;  %v286_v22 = vld [vmem:[#allocation7 + $0x20] sm:$0xff]  ;;  %v287_v23 = vld [vmem:[#allocation7 + $0x28] sm:$0xff] }
  0x4f   :  { %v1132_v20 = vpack.c.bf16 %v285_v18, %v284_v17  ;;  %v108_v24 = vld [vmem:[#allocation5 + $0x50] sm:$0xff]  ;;  %v109_v25 = vld [vmem:[#allocation5 + $0x58] sm:$0xff]  ;;  %v1136_v26 = vpack.c.bf16 %v287_v23, %v286_v22  ;;  %v110_v30 = vld [vmem:[#allocation5 + $0x60] sm:$0xff] }
  0x50   :  { %1129 = vmatprep.subr.bf16.mxu1 %v1128_v19  ;;  %v1116_v27 = vpack.c.bf16 %v109_v25, %v108_v24  ;;  %v288_v28 = vld [vmem:[#allocation7 + $0x30] sm:$0xff]  ;;  %v289_v29 = vld [vmem:[#allocation7 + $0x38] sm:$0xff]  ;;  %v111_v31 = vld [vmem:[#allocation5 + $0x68] sm:$0xff] }
  0x51   :  { %1103 = vmatpush3.bf16.msra.mxu0 %v1100_v5  ;;  %1131 = vmatpush3.bf16.msra.mxu1 %v1128_v19  ;;  %v1140_v32 = vpack.c.bf16 %v289_v29, %v288_v28  ;;  %v1120_v33 = vpack.c.bf16 %v111_v31, %v110_v30  ;;  %v290_v34 = vld [vmem:[#allocation7 + $0x40] sm:$0xff]  ;;  %v291_v35 = vld [vmem:[#allocation7 + $0x48] sm:$0xff]  ;;  %v112_v36 = vld [vmem:[#allocation5 + $0x70] sm:$0xff] }
  0x52   :  { %1105 = vmatprep.subr.bf16.mxu0 %v1104_v8  ;;  %1133 = vmatprep.subr.bf16.mxu1 %v1132_v20  ;;  %v113_v37 = vld [vmem:[#allocation5 + $0x78] sm:$0xff]  ;;  %v1144_v38 = vpack.c.bf16 %v291_v35, %v290_v34  ;;  %v292_v40 = vld [vmem:[#allocation7 + $0x50] sm:$0xff]  ;;  %v294_v43 = vld [vmem:[#allocation7 + $0x60] sm:$0xff] }
  0x53   :  { %v1124_v39 = vpack.c.bf16 %v113_v37, %v112_v36  ;;  %v293_v41 = vld [vmem:[#allocation7 + $0x58] sm:$0xff]  ;;  %v295_v44 = vld [vmem:[#allocation7 + $0x68] sm:$0xff]  ;;  %v84_v47 = vld [vmem:[#allocation2 + $0x10] sm:$0xff] }
  0x54   :  { %v1148_v42 = vpack.c.bf16 %v293_v41, %v292_v40  ;;  %v83_v45 = vld [vmem:[#allocation2 + $0x8] sm:$0xff]  ;;  %v1152_v46 = vpack.c.bf16 %v295_v44, %v294_v43  ;;  %v85_v48 = vld [vmem:[#allocation2 + $0x18] sm:$0xff]  ;;  %v86_v49 = vld [vmem:[#allocation2 + $0x20] sm:$0xff] }
  0x55   :  { %1107 = vmatpush3.bf16.msra.mxu0 %v1104_v8  ;;  %1135 = vmatpush3.bf16.msra.mxu1 %v1132_v20  ;;  %v87_v50 = vld [vmem:[#allocation2 + $0x28] sm:$0xff]  ;;  %v88_v51 = vld [vmem:[#allocation2 + $0x30] sm:$0xff]  ;;  %v89_v52 = vld [vmem:[#allocation2 + $0x38] sm:$0xff] }
  0x56   :  { %1109 = vmatprep.subr.bf16.mxu0 %v1108_v12  ;;  %1137 = vmatprep.subr.bf16.mxu1 %v1136_v26  ;;  %v90_v53 = vld [vmem:[#allocation2 + $0x40] sm:$0xff]  ;;  %v91_v54 = vld [vmem:[#allocation2 + $0x48] sm:$0xff]  ;;  %v92_v55 = vld [vmem:[#allocation2 + $0x50] sm:$0xff] }
  0x57   :  { %v93_v56 = vld [vmem:[#allocation2 + $0x58] sm:$0xff]  ;;  %v94_v57 = vld [vmem:[#allocation2 + $0x60] sm:$0xff]  ;;  %v95_v58 = vld [vmem:[#allocation2 + $0x68] sm:$0xff] }
  0x58   :  { %v96_v59 = vld [vmem:[#allocation2 + $0x70] sm:$0xff]  ;;  %v97_v60 = vld [vmem:[#allocation2 + $0x78] sm:$0xff]  ;;  %v466_v0 = vld [vmem:[#allocation8] sm:$0xff] }
  0x59   :  { %1111 = vmatpush3.bf16.msra.mxu0 %v1108_v12  ;;  %1139 = vmatpush3.bf16.msra.mxu1 %v1136_v26  ;;  %v296_v61 = vld [vmem:[#allocation7 + $0x70] sm:$0xff]  ;;  %v297_v62 = vld [vmem:[#allocation7 + $0x78] sm:$0xff]  ;;  %v467_v1 = vld [vmem:[#allocation8 + $0x8] sm:$0xff] }
  0x5a   :  { %1113 = vmatprep.subr.bf16.mxu0 %v1112_v21  ;;  %1141 = vmatprep.subr.bf16.mxu1 %v1140_v32  ;;  %v1156_v63 = vpack.c.bf16 %v297_v62, %v296_v61  ;;  %v468_v2 = vld [vmem:[#allocation8 + $0x10] sm:$0xff]  ;;  %v1160_v3 = vpack.c.bf16 %v467_v1, %v466_v0  ;;  %v469_v4 = vld [vmem:[#allocation8 + $0x18] sm:$0xff]  ;;  %v470_v6 = vld [vmem:[#allocation8 + $0x20] sm:$0xff] }
  0x5b   :  { %v1164_v5 = vpack.c.bf16 %v469_v4, %v468_v2  ;;  %v471_v7 = vld [vmem:[#allocation8 + $0x28] sm:$0xff]  ;;  %v472_v9 = vld [vmem:[#allocation8 + $0x30] sm:$0xff]  ;;  %v473_v10 = vld [vmem:[#allocation8 + $0x38] sm:$0xff] }
  0x5c   :  { %v1168_v8 = vpack.c.bf16 %v471_v7, %v470_v6  ;;  %v1518_v11 = vpack.c.bf16 %v473_v10, %v472_v9  ;;  %v474_v12 = vld [vmem:[#allocation8 + $0x40] sm:$0xff]  ;;  %v475_v13 = vld [vmem:[#allocation8 + $0x48] sm:$0xff]  ;;  %v476_v15 = vld [vmem:[#allocation8 + $0x50] sm:$0xff] }
  0x5d   :  { %1115 = vmatpush3.bf16.msra.mxu0 %v1112_v21  ;;  %1143 = vmatpush3.bf16.msra.mxu1 %v1140_v32  ;;  %v1521_v14 = vpack.c.bf16 %v475_v13, %v474_v12  ;;  %v477_v16 = vld [vmem:[#allocation8 + $0x58] sm:$0xff]  ;;  %v478_v18 = vld [vmem:[#allocation8 + $0x60] sm:$0xff]  ;;  %v479_v19 = vld [vmem:[#allocation8 + $0x68] sm:$0xff] }
  0x5e   :  { %1117 = vmatprep.subr.bf16.mxu0 %v1116_v27  ;;  %1145 = vmatprep.subr.bf16.mxu1 %v1144_v38  ;;  %v1525_v17 = vpack.c.bf16 %v477_v16, %v476_v15  ;;  %v1529_v20 = vpack.c.bf16 %v479_v19, %v478_v18  ;;  %v1537_v21 = vld [vmem:[%s1666_s2] ss:$0 sm:$0xff]  ;;  %v480_v6 = vld [vmem:[#allocation8 + $0x70] sm:$0xff]  ;;  %v481_v7 = vld [vmem:[#allocation8 + $0x78] sm:$0xff] }
  0x5f   :  { %v830_v9 = vld [vmem:[%s1668_s4] ss:$0 sm:$0xff] }
  0x61   :  { %1119 = vmatpush3.bf16.msra.mxu0 %v1116_v27  ;;  %1147 = vmatpush3.bf16.msra.mxu1 %v1144_v38 }
  0x62   :  { %1121 = vmatprep.subr.bf16.mxu0 %v1120_v33  ;;  %1149 = vmatprep.subr.bf16.mxu1 %v1148_v42 }
  0x65   :  { %1123 = vmatpush3.bf16.msra.mxu0 %v1120_v33  ;;  %1151 = vmatpush3.bf16.msra.mxu1 %v1148_v42 }
  0x66   :  { %1125 = vmatprep.subr.bf16.mxu0 %v1124_v39  ;;  %1153 = vmatprep.subr.bf16.mxu1 %v1152_v46 }
  0x69   :  { %1127 = vmatpush3.bf16.msra.mxu0 %v1124_v39  ;;  %1155 = vmatpush3.bf16.msra.mxu1 %v1152_v46 }
  0x6a   :  { %1157 = vmatprep.subr.bf16.mxu1 %v1156_v63  ;;  %1161 = vmatprep.subr.bf16.mxu0 %v1160_v3 }
  0x6c   :  { %961 = vmatmul.mubr.f32.vlgmr.msra.gmra.mrb[0].mxu0 %v83_v45 }
  0x6d   :  { %963 = vmatprep.mubr.f32.mxu0 %v84_v47  ;;  %1159 = vmatpush3.bf16.msra.mxu1 %v1156_v63 }
  0x6e   :  { %1192 = vmatprep.subr.bf16.mxu1 %v1160_v3  ;;  %1163 = vmatpush3.bf16.msra.mxu0 %v1160_v3 }
  0x6f   :  { %1165 = vmatprep.subr.bf16.mxu0 %v1164_v5 }
  0x70   :  { %964 = vmatmul.mubr.f32.gmra.mrb[2].mxu0 %v85_v48 }
  0x71   :  { %966 = vmatprep.mubr.f32.mxu0 %v86_v49 }
  0x72   :  { %1167 = vmatpush3.bf16.msra.mxu0 %v1164_v5 }
  0x73   :  { %1169 = vmatprep.subr.bf16.mxu0 %v1168_v8 }
  0x74   :  { %967 = vmatmul.mubr.f32.gmra.mrb[4].mxu0 %v87_v50 }
  0x75   :  { %969 = vmatprep.mubr.f32.mxu0 %v88_v51 }
  0x76   :  { %1171 = vmatpush3.bf16.msra.mxu0 %v1168_v8 }
  0x77   :  { %1173 = vmatprep.subr.bf16.mxu0 %v1518_v11 }
  0x78   :  { %970 = vmatmul.mubr.f32.gmra.mrb[6].mxu0 %v89_v52 }
  0x79   :  { %972 = vmatprep.mubr.f32.mxu0 %v90_v53 }
  0x7a   :  { %1175 = vmatpush3.bf16.msra.mxu0 %v1518_v11 }
  0x7b   :  { %1177 = vmatprep.subr.bf16.mxu0 %v1521_v14 }
  0x7c   :  { %973 = vmatmul.mubr.f32.gmra.mrb[8].mxu0 %v91_v54 }
  0x7d   :  { %975 = vmatprep.mubr.f32.mxu0 %v92_v55 }
  0x7e   :  { %1179 = vmatpush3.bf16.msra.mxu0 %v1521_v14 }
  0x7f   :  { %1181 = vmatprep.subr.bf16.mxu0 %v1525_v17 }
  0x80   :  { %976 = vmatmul.mubr.f32.gmra.mrb[10].mxu0 %v93_v56 }
  0x81   :  { %978 = vmatprep.mubr.f32.mxu0 %v94_v57 }
  0x82   :  { %1183 = vmatpush3.bf16.msra.mxu0 %v1525_v17 }
  0x83   :  { %1185 = vmatprep.subr.bf16.mxu0 %v1529_v20 }
  0x84   :  { %979 = vmatmul.mubr.f32.gmra.mrb[12].mxu0 %v95_v58 }
  0x85   :  { %981 = vmatprep.mubr.f32.mxu0 %v96_v59 }
  0x86   :  { %1187 = vmatpush3.bf16.msra.mxu0 %v1529_v20 }
  0x88   :  { %982 = vmatmul.mubr.f32.gmra.mrb[14].mxu0 %v97_v60 }
 0x13f   :  { %v962_v22 = vpop.f32.mrb[0].mxu0 }
 0x140   :  { %v193_v23 = vadd.f32 %v962_v22, %v1537_v21  ;;  %v187_v24 = vpop.f32.mrb[1].mxu0 }
 0x141   :  { %v188_v25 = vadd.f32 %v1537_v21, %v187_v24 }
 0x142   :  { %v267_v28 = vmax.f32 %v193_v23, 0.0 }
 0x143   :  { %v965_v26 = vpop.f32.mrb[2].mxu0  ;;  %v266_v27 = vmax.f32 %v188_v25, 0.0 }
 0x144   :  { %v203_v29 = vadd.f32 %v965_v26, %v1537_v21  ;;  %v197_v30 = vpop.f32.mrb[3].mxu0 }
 0x145   :  { %v198_v31 = vadd.f32 %v1537_v21, %v197_v30  ;;  %1016 = vmatprep.mubr.f32.mxu1 %v266_v27 }
 0x146   :  { %1017 = vmatmul.mubr.f32.vlgmr.msra.gmra.mrb[0].mxu1 %v267_v28  ;;  %v269_v34 = vmax.f32 %v203_v29, 0.0 }
 0x147   :  { %v268_v32 = vmax.f32 %v198_v31, 0.0  ;;  %v968_v33 = vpop.f32.mrb[4].mxu0  ;;  %1200 = vmatpush3.bf16.msra.mxu1 %v1160_v3 }
 0x148   :  { %v213_v35 = vadd.f32 %v968_v33, %v1537_v21  ;;  %v207_v36 = vpop.f32.mrb[5].mxu0  ;;  %1193 = vmatprep.subr.bf16.mxu1 %v1164_v5 }
 0x149   :  { %v208_v37 = vadd.f32 %v1537_v21, %v207_v36  ;;  %1019 = vmatprep.mubr.f32.mxu1 %v268_v32 }
 0x14a   :  { %v271_v38 = vmax.f32 %v213_v35, 0.0  ;;  %1020 = vmatmul.mubr.f32.gmra.mrb[2].mxu1 %v269_v34 }
 0x14b   :  { %v270_v39 = vmax.f32 %v208_v37, 0.0  ;;  %v971_v40 = vpop.f32.mrb[6].mxu0  ;;  %1201 = vmatpush3.bf16.msra.mxu1 %v1164_v5 }
 0x14c   :  { %v223_v41 = vadd.f32 %v971_v40, %v1537_v21  ;;  %v217_v42 = vpop.f32.mrb[7].mxu0  ;;  %1194 = vmatprep.subr.bf16.mxu1 %v1168_v8 }
 0x14d   :  { %v218_v43 = vadd.f32 %v1537_v21, %v217_v42  ;;  %1022 = vmatprep.mubr.f32.mxu1 %v270_v39 }
 0x14e   :  { %v273_v44 = vmax.f32 %v223_v41, 0.0  ;;  %1023 = vmatmul.mubr.f32.gmra.mrb[4].mxu1 %v271_v38 }
 0x14f   :  { %v272_v45 = vmax.f32 %v218_v43, 0.0  ;;  %v974_v46 = vpop.f32.mrb[8].mxu0  ;;  %1202 = vmatpush3.bf16.msra.mxu1 %v1168_v8  ;;  %v1188_v8 = vpack.c.bf16 %v481_v7, %v480_v6 }
 0x150   :  { %v233_v47 = vadd.f32 %v974_v46, %v1537_v21  ;;  %v227_v48 = vpop.f32.mrb[9].mxu0  ;;  %1195 = vmatprep.subr.bf16.mxu1 %v1518_v11 }
 0x151   :  { %v228_v49 = vadd.f32 %v1537_v21, %v227_v48  ;;  %1025 = vmatprep.mubr.f32.mxu1 %v272_v45  ;;  %1189 = vmatprep.subr.bf16.mxu0 %v1188_v8 }
 0x152   :  { %v275_v50 = vmax.f32 %v233_v47, 0.0  ;;  %1026 = vmatmul.mubr.f32.gmra.mrb[6].mxu1 %v273_v44  ;;  %1191 = vmatpush3.bf16.msra.mxu0 %v1188_v8 }
 0x153   :  { %v274_v51 = vmax.f32 %v228_v49, 0.0  ;;  %v977_v52 = vpop.f32.mrb[10].mxu0  ;;  %1203 = vmatpush3.bf16.msra.mxu1 %v1518_v11 }
 0x154   :  { %v243_v53 = vadd.f32 %v977_v52, %v1537_v21  ;;  %v237_v54 = vpop.f32.mrb[11].mxu0  ;;  %1196 = vmatprep.subr.bf16.mxu1 %v1521_v14 }
 0x155   :  { %v238_v55 = vadd.f32 %v1537_v21, %v237_v54  ;;  %1028 = vmatprep.mubr.f32.mxu1 %v274_v51 }
 0x156   :  { %v277_v56 = vmax.f32 %v243_v53, 0.0  ;;  %1029 = vmatmul.mubr.f32.gmra.mrb[8].mxu1 %v275_v50 }
 0x157   :  { %v276_v57 = vmax.f32 %v238_v55, 0.0  ;;  %v980_v58 = vpop.f32.mrb[12].mxu0  ;;  %1204 = vmatpush3.bf16.msra.mxu1 %v1521_v14 }
 0x158   :  { %v253_v59 = vadd.f32 %v980_v58, %v1537_v21  ;;  %v247_v60 = vpop.f32.mrb[13].mxu0  ;;  %1197 = vmatprep.subr.bf16.mxu1 %v1525_v17  ;;  %v831_v58 = vld [vmem:[%s1670_s6] ss:$0 sm:$0xff]  ;;  %s1403_s6 = smov [#allocation10]  }
 0x159   :  { %v248_v61 = vadd.f32 %v1537_v21, %v247_v60  ;;  %1031 = vmatprep.mubr.f32.mxu1 %v276_v57  ;;  %s815_s30 = sshll.u32 %s1403_s6, 4  ;;  %s816_s30 = int_to_ptr.vmem [resolvable:$true] %s815_s30 }
 0x15a   :  { %v279_v62 = vmax.f32 %v253_v59, 0.0  ;;  %1032 = vmatmul.mubr.f32.gmra.mrb[10].mxu1 %v277_v56  ;;  %s1367_s8 = scalar_lea.vmem %s816_s30, 2048  ;;  %p1372_p5 = scmp.lt.s32.totalorder %s816_s30, %s816_s30 }
 0x15b   :  { %v278_v63 = vmax.f32 %v248_v61, 0.0  ;;  %v983_v0 = vpop.f32.mrb[14].mxu0  ;;  %1205 = vmatpush3.bf16.msra.mxu1 %v1525_v17  ;;  %p1368_p4 = scmp.ne.s32.totalorder %s816_s30, %s1367_s8  ;;  %p1373_p6 = scmp.lt.s32.totalorder %s1367_s8, %s1367_s8 }
 0x15c   :  { %v263_v1 = vadd.f32 %v983_v0, %v1537_v21  ;;  %v257_v2 = vpop.f32.mrb[15].mxu0  ;;  %1198 = vmatprep.subr.bf16.mxu1 %v1529_v20 }
 0x15d   :  { %v258_v3 = vadd.f32 %v1537_v21, %v257_v2  ;;  %1034 = vmatprep.mubr.f32.mxu1 %v278_v63  ;;  %p1374_p7 = por %p1373_p6, %p1372_p5 }
 0x15e   :  { %v281_v4 = vmax.f32 %v263_v1, 0.0  ;;  %1035 = vmatmul.mubr.f32.gmra.mrb[12].mxu1 %v279_v62 }
 0x15f   :  { %v280_v5 = vmax.f32 %v258_v3, 0.0  ;;  %1206 = vmatpush3.bf16.msra.mxu1 %v1529_v20  ;;  %p1375_p8 = pnand %p1374_p7, %p1368_p4 }
 0x160   :  { %1199 = vmatprep.subr.bf16.mxu1 %v1188_v8 }
 0x161   :  { %1037 = vmatprep.mubr.f32.mxu1 %v280_v5 }
 0x162   :  { %1038 = vmatmul.mubr.f32.gmra.mrb[14].mxu1 %v281_v4 }
 0x163   :  { %1207 = vmatpush3.bf16.msra.mxu1 %v1188_v8 }
 0x219   :  { %v1018_v10 = vpop.f32.mrb[0].mxu1 }
 0x21a   :  { %v377_v11 = vadd.f32 %v1018_v10, %v830_v9  ;;  %v371_v12 = vpop.f32.mrb[1].mxu1 }
 0x21b   :  { %v372_v13 = vadd.f32 %v830_v9, %v371_v12 }
 0x21c   :  { %v451_v16 = vmax.f32 %v377_v11, 0.0 }
 0x21d   :  { %v450_v14 = vmax.f32 %v372_v13, 0.0  ;;  %v1021_v15 = vpop.f32.mrb[2].mxu1 }
 0x21e   :  { %v387_v17 = vadd.f32 %v1021_v15, %v830_v9  ;;  %v381_v18 = vpop.f32.mrb[3].mxu1 }
 0x21f   :  { %v382_v19 = vadd.f32 %v830_v9, %v381_v18  ;;  %1072 = vmatprep.mubr.f32.mxu0 %v450_v14 }
 0x220   :  { %1073 = vmatmul.mubr.f32.vlgmr.msra.gmra.mrb[16].mxu0 %v451_v16  ;;  %v453_v22 = vmax.f32 %v387_v17, 0.0 }
 0x221   :  { %v452_v20 = vmax.f32 %v382_v19, 0.0  ;;  %v1024_v21 = vpop.f32.mrb[4].mxu1 }
 0x222   :  { %v397_v23 = vadd.f32 %v1024_v21, %v830_v9  ;;  %v391_v24 = vpop.f32.mrb[5].mxu1 }
 0x223   :  { %v392_v25 = vadd.f32 %v830_v9, %v391_v24  ;;  %1075 = vmatprep.mubr.f32.mxu0 %v452_v20 }
 0x224   :  { %v455_v26 = vmax.f32 %v397_v23, 0.0  ;;  %1076 = vmatmul.mubr.f32.gmra.mrb[18].mxu0 %v453_v22 }
 0x225   :  { %v454_v27 = vmax.f32 %v392_v25, 0.0  ;;  %v1027_v28 = vpop.f32.mrb[6].mxu1 }
 0x226   :  { %v407_v29 = vadd.f32 %v1027_v28, %v830_v9  ;;  %v401_v30 = vpop.f32.mrb[7].mxu1 }
 0x227   :  { %v402_v31 = vadd.f32 %v830_v9, %v401_v30  ;;  %1078 = vmatprep.mubr.f32.mxu0 %v454_v27 }
 0x228   :  { %v457_v32 = vmax.f32 %v407_v29, 0.0  ;;  %1079 = vmatmul.mubr.f32.gmra.mrb[20].mxu0 %v455_v26 }
 0x229   :  { %v456_v33 = vmax.f32 %v402_v31, 0.0  ;;  %v1030_v34 = vpop.f32.mrb[8].mxu1 }
 0x22a   :  { %v417_v35 = vadd.f32 %v1030_v34, %v830_v9  ;;  %v411_v36 = vpop.f32.mrb[9].mxu1 }
 0x22b   :  { %v412_v37 = vadd.f32 %v830_v9, %v411_v36  ;;  %1081 = vmatprep.mubr.f32.mxu0 %v456_v33 }
 0x22c   :  { %v459_v38 = vmax.f32 %v417_v35, 0.0  ;;  %1082 = vmatmul.mubr.f32.gmra.mrb[22].mxu0 %v457_v32 }
 0x22d   :  { %v458_v39 = vmax.f32 %v412_v37, 0.0  ;;  %v1033_v40 = vpop.f32.mrb[10].mxu1 }
 0x22e   :  { %v427_v41 = vadd.f32 %v1033_v40, %v830_v9  ;;  %v421_v42 = vpop.f32.mrb[11].mxu1 }
 0x22f   :  { %v422_v43 = vadd.f32 %v830_v9, %v421_v42  ;;  %1084 = vmatprep.mubr.f32.mxu1 %v458_v39 }
 0x230   :  { %v461_v44 = vmax.f32 %v427_v41, 0.0  ;;  %1085 = vmatmul.mubr.f32.vlgmr.msra.gmra.mrb[16].mxu1 %v459_v38 }
 0x231   :  { %v460_v45 = vmax.f32 %v422_v43, 0.0  ;;  %v1036_v46 = vpop.f32.mrb[12].mxu1 }
 0x232   :  { %v437_v47 = vadd.f32 %v1036_v46, %v830_v9  ;;  %v431_v48 = vpop.f32.mrb[13].mxu1 }
 0x233   :  { %v432_v49 = vadd.f32 %v830_v9, %v431_v48  ;;  %1087 = vmatprep.mubr.f32.mxu1 %v460_v45 }
 0x234   :  { %v463_v50 = vmax.f32 %v437_v47, 0.0  ;;  %1088 = vmatmul.mubr.f32.gmra.mrb[18].mxu1 %v461_v44 }
 0x235   :  { %v462_v51 = vmax.f32 %v432_v49, 0.0  ;;  %v1039_v52 = vpop.f32.mrb[14].mxu1 }
 0x236   :  { %v447_v53 = vadd.f32 %v1039_v52, %v830_v9  ;;  %v441_v54 = vpop.f32.mrb[15].mxu1 }
 0x237   :  { %v442_v55 = vadd.f32 %v830_v9, %v441_v54  ;;  %1090 = vmatprep.mubr.f32.mxu1 %v462_v51 }
 0x238   :  { %v465_v56 = vmax.f32 %v447_v53, 0.0  ;;  %1091 = vmatmul.mubr.f32.gmra.mrb[20].mxu1 %v463_v50 }
 0x239   :  { %v464_v57 = vmax.f32 %v442_v55, 0.0 }
 0x23b   :  { %1093 = vmatprep.mubr.f32.mxu1 %v464_v57 }
 0x23c   :  { %1094 = vmatmul.mubr.f32.gmra.mrb[22].mxu1 %v465_v56 }
 0x2f3   :  { %v1074_v59 = vpop.f32.mrb[16].mxu0 }
 0x2f4   :  { %v561_v60 = vadd.f32 %v1074_v59, %v831_v58  ;;  %v555_v61 = vpop.f32.mrb[17].mxu0 }
 0x2f5   :  { %v556_v63 = vadd.f32 %v831_v58, %v555_v61 }
 0x2f6   :  { %636 = vmax.xlane.f32.xlu0 %v561_v60 }
 0x2f7   :  { %v1077_v62 = vpop.f32.mrb[18].mxu0 }
 0x2f8   :  { %v571_v0 = vadd.f32 %v1077_v62, %v831_v58  ;;  %v565_v1 = vpop.f32.mrb[19].mxu0 }
 0x2f9   :  { %v566_v3 = vadd.f32 %v831_v58, %v565_v1 }
 0x2fa   :  { %640 = vmax.xlane.f32.xlu1 %v571_v0  ;;  %634 = vmax.xlane.f32.xlu0 %v556_v63 }
 0x2fb   :  { %v1080_v2 = vpop.f32.mrb[20].mxu0 }
 0x2fc   :  { %v575_v4 = vpop.f32.mrb[21].mxu0  ;;  %v581_v7 = vadd.f32 %v1080_v2, %v831_v58 }
 0x2fd   :  { %v576_v5 = vadd.f32 %v831_v58, %v575_v4 }
 0x2fe   :  { %638 = vmax.xlane.f32.xlu1 %v566_v3 }
 0x2ff   :  { %v1083_v6 = vpop.f32.mrb[22].mxu0  ;;  %642 = vmax.xlane.f32.xlu0 %v576_v5 }
 0x300   :  { %v585_v8 = vpop.f32.mrb[23].mxu0  ;;  %v591_v11 = vadd.f32 %v1083_v6, %v831_v58 }
 0x301   :  { %v586_v9 = vadd.f32 %v831_v58, %v585_v8 }
 0x302   :  { %644 = vmax.xlane.f32.xlu1 %v581_v7 }
 0x303   :  { %v1086_v10 = vpop.f32.mrb[16].mxu1  ;;  %646 = vmax.xlane.f32.xlu0 %v586_v9 }
 0x304   :  { %v595_v12 = vpop.f32.mrb[17].mxu1  ;;  %v601_v15 = vadd.f32 %v1086_v10, %v831_v58 }
 0x305   :  { %v596_v13 = vadd.f32 %v831_v58, %v595_v12 }
 0x306   :  { %648 = vmax.xlane.f32.xlu1 %v591_v11 }
 0x307   :  { %v1089_v14 = vpop.f32.mrb[18].mxu1  ;;  %650 = vmax.xlane.f32.xlu0 %v596_v13 }
 0x308   :  { %v605_v16 = vpop.f32.mrb[19].mxu1  ;;  %v611_v19 = vadd.f32 %v1089_v14, %v831_v58 }
 0x309   :  { %v606_v17 = vadd.f32 %v831_v58, %v605_v16 }
 0x30a   :  { %652 = vmax.xlane.f32.xlu1 %v601_v15 }
 0x30b   :  { %v1092_v18 = vpop.f32.mrb[20].mxu1  ;;  %654 = vmax.xlane.f32.xlu0 %v606_v17 }
 0x30c   :  { %v615_v20 = vpop.f32.mrb[21].mxu1  ;;  %v1572_v23 = vadd.f32 %v1092_v18, %v831_v58 }
 0x30d   :  { %v1569_v21 = vadd.f32 %v831_v58, %v615_v20 }
 0x30e   :  { %656 = vmax.xlane.f32.xlu1 %v611_v19 }
 0x30f   :  { %v1095_v22 = vpop.f32.mrb[22].mxu1  ;;  %658 = vmax.xlane.f32.xlu0 %v1569_v21 }
 0x310   :  { %v625_v24 = vpop.f32.mrb[23].mxu1  ;;  %v1578_v26 = vadd.f32 %v1095_v22, %v831_v58 }
 0x311   :  { %v1574_v25 = vadd.f32 %v831_v58, %v625_v24 }
 0x312   :  { %660 = vmax.xlane.f32.xlu1 %v1572_v23 }
 0x313   :  { %662 = vmax.xlane.f32.xlu0 %v1574_v25 }
 0x316   :  { %664 = vmax.xlane.f32.xlu1 %v1578_v26 }
 0x383   :  { %v637_v27 = vpop.xlane.xlu0 %636 }
 0x384   :  { %v1581_v28 = vsub.f32 %v561_v60, %v637_v27 }
 0x386   :  { %v684_v29 = vmul.f32 1.442695, %v1581_v28 }
 0x387   :  { %v641_v30 = vpop.xlane.xlu1 %640  ;;  %v635_v31 = vpop.xlane.xlu0 %634 }
 0x388   :  { %1215 = vpow2.f32 %v684_v29  ;;  %v1584_v32 = vsub.f32 %v571_v0, %v641_v30  ;;  %v1586_v33 = vsub.f32 %v556_v63, %v635_v31 }
 0x38a   :  { %v688_v34 = vmul.f32 1.442695, %v1584_v32  ;;  %v682_v35 = vmul.f32 1.442695, %v1586_v33 }
 0x38b   :  { %v639_v36 = vpop.xlane.xlu1 %638 }
 0x38c   :  { %1217 = vpow2.f32 %v688_v34  ;;  %v1590_v37 = vsub.f32 %v566_v3, %v639_v36  ;;  %v643_v38 = vpop.xlane.xlu0 %642 }
 0x38d   :  { %1219 = vpow2.f32 %v682_v35  ;;  %v1592_v39 = vsub.f32 %v576_v5, %v643_v38 }
 0x38e   :  { %v686_v40 = vmul.f32 1.442695, %v1590_v37 }
 0x38f   :  { %v645_v41 = vpop.xlane.xlu1 %644  ;;  %v690_v44 = vmul.f32 1.442695, %v1592_v39 }
 0x390   :  { %1221 = vpow2.f32 %v686_v40  ;;  %v1595_v42 = vsub.f32 %v581_v7, %v645_v41  ;;  %v647_v43 = vpop.xlane.xlu0 %646 }
 0x391   :  { %v1598_v45 = vsub.f32 %v586_v9, %v647_v43 }
 0x392   :  { %v1216_v46 = vpop.eup %1215  ;;  %v692_v47 = vmul.f32 1.442695, %v1595_v42 }
 0x393   :  { %716 = vadd.xlane.f32.xlu1 %v1216_v46  ;;  %v649_v48 = vpop.xlane.xlu1 %648  ;;  %v694_v51 = vmul.f32 1.442695, %v1598_v45 }
 0x394   :  { %1223 = vpow2.f32 %v692_v47  ;;  %v1601_v49 = vsub.f32 %v591_v11, %v649_v48  ;;  %v651_v50 = vpop.xlane.xlu0 %650 }
 0x395   :  { %1225 = vpow2.f32 %v690_v44  ;;  %v1604_v52 = vsub.f32 %v596_v13, %v651_v50 }
 0x396   :  { %v1218_v53 = vpop.eup %1217  ;;  %v696_v54 = vmul.f32 1.442695, %v1601_v49 }
 0x397   :  { %v1220_v55 = vpop.eup %1219  ;;  %720 = vadd.xlane.f32.xlu1 %v1218_v53  ;;  %v653_v56 = vpop.xlane.xlu1 %652  ;;  %v698_v59 = vmul.f32 1.442695, %v1604_v52 }
 0x398   :  { %1227 = vpow2.f32 %v696_v54  ;;  %v1607_v57 = vsub.f32 %v601_v15, %v653_v56  ;;  %714 = vadd.xlane.f32.xlu0 %v1220_v55  ;;  %v655_v58 = vpop.xlane.xlu0 %654 }
 0x399   :  { %1229 = vpow2.f32 %v694_v51  ;;  %v1610_v60 = vsub.f32 %v606_v17, %v655_v58 }
 0x39a   :  { %v1222_v61 = vpop.eup %1221  ;;  %v700_v62 = vmul.f32 1.442695, %v1607_v57 }
 0x39b   :  { %v657_v63 = vpop.xlane.xlu1 %656  ;;  %v702_v2 = vmul.f32 1.442695, %v1610_v60 }
 0x39c   :  { %1231 = vpow2.f32 %v700_v62  ;;  %v1613_v0 = vsub.f32 %v611_v19, %v657_v63  ;;  %718 = vadd.xlane.f32.xlu0 %v1222_v61  ;;  %v659_v1 = vpop.xlane.xlu0 %658 }
 0x39d   :  { %1233 = vpow2.f32 %v698_v59  ;;  %v1617_v3 = vsub.f32 %v1569_v21, %v659_v1 }
 0x39e   :  { %v1224_v4 = vpop.eup %1223  ;;  %v704_v5 = vmul.f32 1.442695, %v1613_v0 }
 0x39f   :  { %v1226_v6 = vpop.eup %1225  ;;  %724 = vadd.xlane.f32.xlu1 %v1224_v4  ;;  %v661_v7 = vpop.xlane.xlu1 %660  ;;  %v706_v10 = vmul.f32 1.442695, %v1617_v3 }
 0x3a0   :  { %1235 = vpow2.f32 %v704_v5  ;;  %v1621_v8 = vsub.f32 %v1572_v23, %v661_v7  ;;  %722 = vadd.xlane.f32.xlu0 %v1226_v6  ;;  %v663_v9 = vpop.xlane.xlu0 %662 }
 0x3a1   :  { %1237 = vpow2.f32 %v702_v2  ;;  %v1625_v11 = vsub.f32 %v1574_v25, %v663_v9 }
 0x3a2   :  { %v1228_v12 = vpop.eup %1227  ;;  %v708_v13 = vmul.f32 1.442695, %v1621_v8 }
 0x3a3   :  { %v1230_v14 = vpop.eup %1229  ;;  %728 = vadd.xlane.f32.xlu1 %v1228_v12  ;;  %v665_v15 = vpop.xlane.xlu1 %664  ;;  %v710_v17 = vmul.f32 1.442695, %v1625_v11 }
 0x3a4   :  { %1239 = vpow2.f32 %v708_v13  ;;  %v1629_v16 = vsub.f32 %v1578_v26, %v665_v15  ;;  %726 = vadd.xlane.f32.xlu0 %v1230_v14 }
 0x3a5   :  { %1241 = vpow2.f32 %v706_v10 }
 0x3a6   :  { %v1232_v18 = vpop.eup %1231  ;;  %v712_v19 = vmul.f32 1.442695, %v1629_v16 }
 0x3a7   :  { %v1234_v20 = vpop.eup %1233  ;;  %732 = vadd.xlane.f32.xlu1 %v1232_v18 }
 0x3a8   :  { %1243 = vpow2.f32 %v712_v19  ;;  %730 = vadd.xlane.f32.xlu0 %v1234_v20 }
 0x3a9   :  { %1245 = vpow2.f32 %v710_v17 }
 0x3aa   :  { %v1236_v21 = vpop.eup %1235 }
 0x3ab   :  { %v1238_v22 = vpop.eup %1237  ;;  %736 = vadd.xlane.f32.xlu1 %v1236_v21 }
 0x3ac   :  { %734 = vadd.xlane.f32.xlu0 %v1238_v22 }
 0x3ae   :  { %v1240_v23 = vpop.eup %1239 }
 0x3af   :  { %v1242_v24 = vpop.eup %1241  ;;  %740 = vadd.xlane.f32.xlu1 %v1240_v23 }
 0x3b0   :  { %738 = vadd.xlane.f32.xlu0 %v1242_v24 }
 0x3b2   :  { %v1244_v25 = vpop.eup %1243 }
 0x3b3   :  { %v1246_v26 = vpop.eup %1245  ;;  %744 = vadd.xlane.f32.xlu1 %v1244_v25 }
 0x3b4   :  { %742 = vadd.xlane.f32.xlu0 %v1246_v26 }
 0x420   :  { %v717_v27 = vpop.xlane.xlu1 %716 }
 0x421   :  { %1247 = vlog2.f32 %v717_v27 }
 0x424   :  { %v721_v29 = vpop.xlane.xlu1 %720 }
 0x425   :  { %1249 = vlog2.f32 %v721_v29  ;;  %v715_v30 = vpop.xlane.xlu0 %714 }
 0x426   :  { %1251 = vlog2.f32 %v715_v30 }
 0x429   :  { %v719_v31 = vpop.xlane.xlu0 %718 }
 0x42a   :  { %1253 = vlog2.f32 %v719_v31 }
 0x42b   :  { %v1248_v34 = vpop.eup %1247 }
 0x42c   :  { %v749_v35 = vmul.f32 0.6931472, %v1248_v34  ;;  %v725_v36 = vpop.xlane.xlu1 %724 }
 0x42d   :  { %1255 = vlog2.f32 %v725_v36  ;;  %v723_v38 = vpop.xlane.xlu0 %722 }
 0x42e   :  { %v779_v40 = vsub.f32 %v1581_v28, %v749_v35  ;;  %1257 = vlog2.f32 %v723_v38 }
 0x42f   :  { %v1250_v41 = vpop.eup %1249 }
 0x430   :  { %v1252_v43 = vpop.eup %1251  ;;  %795 = vst [vmem:[#allocation10 + $0x8] sm:$0xff] %v779_v40  ;;  %v753_v44 = vmul.f32 0.6931472, %v1250_v41  ;;  %v729_v46 = vpop.xlane.xlu1 %728 }
 0x431   :  { %v747_v47 = vmul.f32 0.6931472, %v1252_v43  ;;  %1259 = vlog2.f32 %v729_v46  ;;  %v727_v48 = vpop.xlane.xlu0 %726 }
 0x432   :  { %v781_v50 = vsub.f32 %v1584_v32, %v753_v44  ;;  %1261 = vlog2.f32 %v727_v48 }
 0x433   :  { %v778_v51 = vsub.f32 %v1586_v33, %v747_v47 }
 0x434   :  { %v1254_v53 = vpop.eup %1253  ;;  %797 = vst [vmem:[#allocation10 + $0x18] sm:$0xff] %v781_v50  ;;  %v733_v54 = vpop.xlane.xlu1 %732 }
 0x435   :  { %794 = vst [vmem:[#allocation10] sm:$0xff] %v778_v51  ;;  %v751_v55 = vmul.f32 0.6931472, %v1254_v53  ;;  %1263 = vlog2.f32 %v733_v54  ;;  %v731_v28 = vpop.xlane.xlu0 %730 }
 0x436   :  { %1265 = vlog2.f32 %v731_v28 }
 0x437   :  { %v1256_v56 = vpop.eup %1255  ;;  %v780_v58 = vsub.f32 %v1590_v37, %v751_v55 }
 0x438   :  { %v1258_v59 = vpop.eup %1257  ;;  %v757_v61 = vmul.f32 0.6931472, %v1256_v56  ;;  %v737_v62 = vpop.xlane.xlu1 %736 }
 0x439   :  { %796 = vst [vmem:[#allocation10 + $0x10] sm:$0xff] %v780_v58  ;;  %v755_v63 = vmul.f32 0.6931472, %v1258_v59  ;;  %1267 = vlog2.f32 %v737_v62  ;;  %v735_v32 = vpop.xlane.xlu0 %734 }
 0x43a   :  { %v783_v33 = vsub.f32 %v1595_v42, %v757_v61  ;;  %1269 = vlog2.f32 %v735_v32 }
 0x43b   :  { %v1260_v1 = vpop.eup %1259  ;;  %v782_v2 = vsub.f32 %v1592_v39, %v755_v63 }
 0x43c   :  { %v1262_v4 = vpop.eup %1261  ;;  %799 = vst [vmem:[#allocation10 + $0x28] sm:$0xff] %v783_v33  ;;  %v761_v5 = vmul.f32 0.6931472, %v1260_v1  ;;  %v741_v6 = vpop.xlane.xlu1 %740 }
 0x43d   :  { %798 = vst [vmem:[#allocation10 + $0x20] sm:$0xff] %v782_v2  ;;  %v759_v7 = vmul.f32 0.6931472, %v1262_v4  ;;  %1271 = vlog2.f32 %v741_v6  ;;  %v739_v37 = vpop.xlane.xlu0 %738 }
 0x43e   :  { %v785_v9 = vsub.f32 %v1601_v49, %v761_v5  ;;  %1273 = vlog2.f32 %v739_v37 }
 0x43f   :  { %v1264_v10 = vpop.eup %1263  ;;  %v784_v12 = vsub.f32 %v1598_v45, %v759_v7 }
 0x440   :  { %v1266_v13 = vpop.eup %1265  ;;  %801 = vst [vmem:[#allocation10 + $0x38] sm:$0xff] %v785_v9  ;;  %v765_v42 = vmul.f32 0.6931472, %v1264_v10  ;;  %v745_v14 = vpop.xlane.xlu1 %744 }
 0x441   :  { %800 = vst [vmem:[#allocation10 + $0x30] sm:$0xff] %v784_v12  ;;  %v763_v39 = vmul.f32 0.6931472, %v1266_v13  ;;  %1275 = vlog2.f32 %v745_v14  ;;  %v743_v15 = vpop.xlane.xlu0 %742 }
 0x442   :  { %v787_v17 = vsub.f32 %v1607_v57, %v765_v42  ;;  %1277 = vlog2.f32 %v743_v15 }
 0x443   :  { %v1268_v18 = vpop.eup %1267  ;;  %v786_v19 = vsub.f32 %v1604_v52, %v763_v39 }
 0x444   :  { %v1270_v20 = vpop.eup %1269  ;;  %803 = vst [vmem:[#allocation10 + $0x48] sm:$0xff] %v787_v17  ;;  %v769_v49 = vmul.f32 0.6931472, %v1268_v18 }
 0x445   :  { %802 = vst [vmem:[#allocation10 + $0x40] sm:$0xff] %v786_v19  ;;  %v767_v21 = vmul.f32 0.6931472, %v1270_v20 }
 0x446   :  { %v789_v45 = vsub.f32 %v1613_v0, %v769_v49 }
 0x447   :  { %v1272_v22 = vpop.eup %1271  ;;  %v788_v23 = vsub.f32 %v1610_v60, %v767_v21 }
 0x448   :  { %v1274_v24 = vpop.eup %1273  ;;  %805 = vst [vmem:[#allocation10 + $0x58] sm:$0xff] %v789_v45  ;;  %v773_v25 = vmul.f32 0.6931472, %v1272_v22 }
 0x449   :  { %804 = vst [vmem:[#allocation10 + $0x50] sm:$0xff] %v788_v23  ;;  %v771_v26 = vmul.f32 0.6931472, %v1274_v24 }
 0x44a   :  { %v791_v57 = vsub.f32 %v1621_v8, %v773_v25 }
 0x44b   :  { %v1276_v27 = vpop.eup %1275  ;;  %v790_v52 = vsub.f32 %v1617_v3, %v771_v26 }
 0x44c   :  { %v1278_v29 = vpop.eup %1277  ;;  %807 = vst [vmem:[#allocation10 + $0x68] sm:$0xff] %v791_v57  ;;  %v777_v30 = vmul.f32 0.6931472, %v1276_v27 }
 0x44d   :  { %806 = vst [vmem:[#allocation10 + $0x60] sm:$0xff] %v790_v52  ;;  %v775_v0 = vmul.f32 0.6931472, %v1278_v29 }
 0x44e   :  { %v793_v31 = vsub.f32 %v1629_v16, %v777_v30 }
 0x44f   :  { %v792_v60 = vsub.f32 %v1625_v11, %v775_v0 }
 0x450   :  { %809 = vst [vmem:[#allocation10 + $0x78] sm:$0xff] %v793_v31 }
 0x451   :  { %808 = vst [vmem:[#allocation10 + $0x70] sm:$0xff] %v792_v60 }
 0x452   :  { %1378 = shalt.err (!%p1375_p8)
}
 0x453   :  { %s1379_s11 = scalar_lea.hbm %s1671_s7, 2048 }
 0x454   :  { %p1380_p9 = scmp.ne.s32.totalorder %s1671_s7, %s1379_s11  ;;  %p1383_p10 = scmp.lt.u32.totalorder %s1379_s11, %s1671_s7 }
 0x456   :  { %p1385_p11 = pnand %p1383_p10, %p1380_p9 }
 0x458   :  { %1388 = shalt.err (!%p1385_p11)
}
 0x459   :  { %821 = dma.vmem_to_hbm [thread:$0]  %s816_s30, 2048, %s1671_s7, [#allocation4], %s1399_s13, %s1399_s13, %s1400_s14  }
 0x45a   :  { %1395 = dma.done.wait [#allocation4], 2048  }
 0x45b   :  { %1396 = vsyncadd [#allocation4], 4294965248 }
 0x45c   :  { %825 = vsyncpa [#allocation3], 1 }
 0x45d   :  { %826 = vsyncpa [#allocation6], 1 }
 0x45e   :  { %827 = vsyncpa [#allocation9], 1 }
 0x45f   :  { %828 = vsyncpa [#allocation4], 1 }

</bundles_post_ra>
